<compile_context>
chip_gen: v6e
topology: v6e:2x2x1
jax: 0.10.0
libtpu: 0.0.40
codegen_flags: <defaults>
</compile_context>

<pallas_src>
import jax
import jax.numpy as jnp
from jax import lax
from jax.experimental import pallas as pl
from jax.experimental.pallas import tpu as pltpu


# ---------------------------------------------------------------------------
# Fused Pallas kernel: conv1x1+ReLU -> conv3x3(VALID)+ReLU -> MaxPool2d(2,2)
# ---------------------------------------------------------------------------
def _make_convblock2_kernel(B_TILE, H, W, Cin, C1, C2, EXT_PAD, PH, PW):
    HW = H * W
    TOT = B_TILE * HW

    def kernel(x_ref, w1_ref, b1_ref, w2_ref, b2_ref, o_ref,
               y1cat_ref, y2_ref, vm_ref):
        # x_ref    : (TOT, Cin)          bf16  flattened NHWC activations (B_TILE images)
        # w1_ref   : (Cin, C1)           bf16
        # b1_ref   : (1, C1)             f32
        # w2_ref   : (3, 3*C1, C2)       bf16  [kh, kw*C1 + ci, co]
        # b2_ref   : (1, C2)             f32
        # o_ref    : (B_TILE, PH*PW, C2) f32   pooled output (flattened spatial)
        # y1cat_ref: (TOT, 3*C1)         bf16  y1cat[r] = [y1[r], y1[r+1], y1[r+2]]
        # y2_ref   : (EXT_PAD, C2)       f32   conv2 output, width-extended rows
        # vm_ref   : (PH*W, C2)          f32   vertical 2-row max scratch

        # ---- Conv2d(Cin->C1, k=1) + ReLU: one (TOT, Cin) @ (Cin, C1) matmul ----
        y1 = jnp.dot(x_ref[...], w1_ref[...], preferred_element_type=jnp.float32)
        y1cat_ref[:, :C1] = jnp.maximum(y1 + b1_ref[...], 0.0).astype(jnp.bfloat16)

        for b in range(B_TILE):
            base = b * HW

            # ---- Build the lane-concatenated kw-shifted copies of y1 (per image).
            # The only misaligned sublane reads happen here, once, instead of in
            # front of every MXU push.  Tail rows of the shifted blocks are zeroed;
            # they only feed extended rows >= EXT, which the pooling never reads.
            y1cat_ref[pl.ds(base + HW - 2, 2), C1:] = jnp.zeros((2, 2 * C1),
                                                                jnp.bfloat16)
            y1cat_ref[pl.ds(base, HW - 1), C1:2 * C1] = \
                y1cat_ref[pl.ds(base + 1, HW - 1), :C1]
            y1cat_ref[pl.ds(base, HW - 2), 2 * C1:] = \
                y1cat_ref[pl.ds(base + 2, HW - 2), :C1]

            # ---- Conv2d(C1->C2, k=3, s=1, VALID) + ReLU -------------------------
            # 3 accumulating K=384 matmuls (kw merged into the contraction dim);
            # operand slices start at base + kh*W (16-aligned for bf16 packing).
            # Extended-output row q = ho*W + wo; wrap-around columns are unread.
            # Bias b2 is folded into the first tap -> no zero-init pass.
            acc = jnp.dot(y1cat_ref[pl.ds(base, EXT_PAD), :], w2_ref[0],
                          preferred_element_type=jnp.float32) + b2_ref[...]
            acc = acc + jnp.dot(y1cat_ref[pl.ds(base + W, EXT_PAD), :], w2_ref[1],
                                preferred_element_type=jnp.float32)
            acc = acc + jnp.dot(y1cat_ref[pl.ds(base + 2 * W, EXT_PAD), :], w2_ref[2],
                                preferred_element_type=jnp.float32)
            y2_ref[...] = jnp.maximum(acc, 0.0)

            # ---- MaxPool2d(2, stride=2) -----------------------------------------
            # Vertical row-pair max with dense, aligned loads/stores ...
            for ph in range(PH):
                rb = 2 * ph * W
                vm_ref[pl.ds(ph * W, W), :] = jnp.maximum(
                    y2_ref[pl.ds(rb, W), :], y2_ref[pl.ds(rb + W, W), :])
            # ... then horizontal even/odd max (2 strided loads per pooled row,
            # down from 4) and a single coalesced lane-dense store per image.
            pooled = jnp.concatenate(
                [jnp.maximum(vm_ref[pl.ds(ph * W, PW, stride=2), :],
                             vm_ref[pl.ds(ph * W + 1, PW, stride=2), :])
                 for ph in range(PH)], axis=0)
            o_ref[b] = pooled

    return kernel


# ---------------------------------------------------------------------------
# ConvBlock2 forward (PyTorch NCHW API boundary, OIHW weights)
# ---------------------------------------------------------------------------
def conv_block2_forward(x_nchw, w1, b1, w2, b2):
    N, Cin, H, W = x_nchw.shape
    C1 = w1.shape[0]
    C2 = w2.shape[0]
    Ho, Wo = H - 2, W - 2                    # 3x3 VALID, stride 1
    PH, PW = Ho // 2, Wo // 2                # MaxPool2d(2, 2)
    HW = H * W
    EXT = (Ho - 1) * W + Wo                  # extended conv2 rows actually needed
    EXT_PAD = ((EXT + 7) // 8) * 8           # pad conv2 M to full f32 sublane tiles
    # Padded tap slices (start 2*W, length EXT_PAD) must stay inside one image's
    # HW rows of y1cat (holds for W=16: 32 + 224 == 256).  No OOB reads.
    assert 2 * W + EXT_PAD <= HW

    # Batch tile per grid step: amortize per-step overhead for larger N while
    # keeping >= 2 "parallel" steps so both v7x TensorCores get work.
    if N >= 2 and N % 2 == 0:
        B_TILE = N // 2
        while B_TILE > 8 and B_TILE % 2 == 0:   # keep per-step VMEM ~1-2 MiB
            B_TILE //= 2
    else:
        B_TILE = 1
    GRID_N = N // B_TILE

    # Layout glue (outside the kernel; weight transforms would be hoisted to init
    # in a real model): NCHW -> flattened NHWC, OIHW -> matmul form with the kw
    # taps lane-merged into the contraction dim.
    x_flat = (jnp.transpose(x_nchw, (0, 2, 3, 1))
              .reshape(N * HW, Cin).astype(jnp.bfloat16))
    w1m = jnp.transpose(w1[:, :, 0, 0]).astype(jnp.bfloat16)          # (Cin, C1)
    w2cat = (jnp.transpose(w2, (2, 3, 1, 0))                          # (kh, kw, ci, co)
             .reshape(3, 3 * C1, C2).astype(jnp.bfloat16))            # [kh, kw*C1+ci, co]
    b1r = b1.reshape(1, C1).astype(jnp.float32)
    b2r = b2.reshape(1, C2).astype(jnp.float32)

    kernel = _make_convblock2_kernel(B_TILE, H, W, Cin, C1, C2, EXT_PAD, PH, PW)

    flops = 2 * N * (HW * Cin * C1 + 3 * EXT_PAD * 3 * C1 * C2)
    bytes_accessed = (x_flat.size * 2 + w1m.size * 2 + w2cat.size * 2
                      + b1r.size * 4 + b2r.size * 4 + N * PH * PW * C2 * 4)

    out_flat = pl.pallas_call(
        kernel,
        grid=(GRID_N,),
        in_specs=[
            pl.BlockSpec((B_TILE * HW, Cin), lambda n: (n, 0)),
            pl.BlockSpec((Cin, C1),          lambda n: (0, 0)),
            pl.BlockSpec((1, C1),            lambda n: (0, 0)),
            pl.BlockSpec((3, 3 * C1, C2),    lambda n: (0, 0, 0)),
            pl.BlockSpec((1, C2),            lambda n: (0, 0)),
        ],
        out_specs=pl.BlockSpec((B_TILE, PH * PW, C2), lambda n: (n, 0, 0)),
        out_shape=jax.ShapeDtypeStruct((N, PH * PW, C2), jnp.float32),
        scratch_shapes=[
            pltpu.VMEM((B_TILE * HW, 3 * C1), jnp.bfloat16),   # y1cat (shifted copies)
            pltpu.VMEM((EXT_PAD, C2), jnp.float32),            # y2 (extended conv2 rows)
            pltpu.VMEM((PH * W, C2), jnp.float32),             # vertical-max scratch
        ],
        compiler_params=pltpu.CompilerParams(dimension_semantics=("parallel",)),
        cost_estimate=pl.CostEstimate(flops=flops, transcendentals=0,
                                      bytes_accessed=bytes_accessed),
    )(x_flat, w1m, b1r, w2cat, b2r)

    # Module boundary stays NCHW f32 to match the PyTorch module.
    return jnp.transpose(out_flat.reshape(N, PH, PW, C2), (0, 3, 1, 2))


# ---------------------------------------------------------------------------
# Pure-JAX reference (matches PyTorch ConvBlock2 semantics) for validation
# ---------------------------------------------------------------------------
def ref_forward(x, w1, b1, w2, b2):
    dn = ("NCHW", "OIHW", "NCHW")
    y = lax.conv_general_dilated(x, w1, (1, 1), "VALID", dimension_numbers=dn)
    y = jnp.maximum(y + b1[None, :, None, None], 0.0)
    y = lax.conv_general_dilated(y, w2, (1, 1), "VALID", dimension_numbers=dn)
    y = jnp.maximum(y + b2[None, :, None, None], 0.0)
    y = lax.reduce_window(y, -jnp.inf, lax.max, (1, 1, 2, 2), (1, 1, 2, 2), "VALID")
    return y


# ---------------------------------------------------------------------------
if __name__ == "__main__":
    key = jax.random.PRNGKey(0)
    ks = jax.random.split(key, 5)

    # Module-implied shapes: Conv2d(64, 128, k=1), Conv2d(128, 128, k=3, s=1)
    x = jax.random.normal(ks[0], (2, 64, 16, 16), jnp.float32)
    w1 = jax.random.normal(ks[1], (128, 64, 1, 1), jnp.float32) / jnp.sqrt(64.0)
    b1 = jax.random.normal(ks[2], (128,), jnp.float32) * 0.1
    w2 = jax.random.normal(ks[3], (128, 128, 3, 3), jnp.float32) / jnp.sqrt(128.0 * 9.0)
    b2 = jax.random.normal(ks[4], (128,), jnp.float32) * 0.1

    fwd = jax.jit(conv_block2_forward)
    out = jax.block_until_ready(fwd(x, w1, b1, w2, b2))
    assert out.shape == (2, 128, 7, 7), out.shape

    ref = jax.block_until_ready(ref_forward(x, w1, b1, w2, b2))
    rel_err = float(jnp.max(jnp.abs(out - ref)) / (jnp.max(jnp.abs(ref)) + 1e-6))
    # bf16 operands with f32 accumulation.
    assert rel_err < 2e-2, f"mismatch vs reference: rel_err={rel_err}"

    print("KERNEL_OK")
</pallas_src>

<mosaic_0001>
module attributes {stable_mosaic.version = 11 : i64} {
  func.func @kernel(%arg0: i32, %arg1: memref<256x64xbf16, #tpu.memory_space<vmem>>, %arg2: memref<64x128xbf16, #tpu.memory_space<vmem>>, %arg3: memref<1x128xf32, #tpu.memory_space<vmem>>, %arg4: memref<3x384x128xbf16, #tpu.memory_space<vmem>>, %arg5: memref<1x128xf32, #tpu.memory_space<vmem>>, %arg6: memref<1x49x128xf32, #tpu.memory_space<vmem>>, %arg7: memref<256x384xbf16, #tpu.memory_space<vmem>>, %arg8: memref<224x128xf32, #tpu.memory_space<vmem>>, %arg9: memref<112x128xf32, #tpu.memory_space<vmem>>) attributes {dimension_semantics = [#tpu.dimension_semantics<parallel>], iteration_bounds = array<i64: 2>, scalar_prefetch = 0 : i64, scratch_operands = 3 : i64, tpu.core_type = #tpu.core_type<tc>, window_params = [{transform_indices = @transform_0, window_bounds = array<i64: 256, 64>}, {pipeline_mode = #tpu.pipeline_mode<synchronous>, transform_indices = @transform_1, window_bounds = array<i64: 64, 128>}, {pipeline_mode = #tpu.pipeline_mode<synchronous>, transform_indices = @transform_2, window_bounds = array<i64: 1, 128>}, {pipeline_mode = #tpu.pipeline_mode<synchronous>, transform_indices = @transform_3, window_bounds = array<i64: 3, 384, 128>}, {pipeline_mode = #tpu.pipeline_mode<synchronous>, transform_indices = @transform_4, window_bounds = array<i64: 1, 128>}, {transform_indices = @transform_5, window_bounds = array<i64: 1, 49, 128>}]} {
    %c0 = arith.constant 0 : index
    %c0_0 = arith.constant 0 : index
    %0 = vector.load %arg1[%c0, %c0_0] : memref<256x64xbf16, #tpu.memory_space<vmem>>, vector<256x64xbf16>
    %c0_1 = arith.constant 0 : index
    %c0_2 = arith.constant 0 : index
    %1 = vector.load %arg2[%c0_1, %c0_2] : memref<64x128xbf16, #tpu.memory_space<vmem>>, vector<64x128xbf16>
    %cst = arith.constant dense<0.000000e+00> : vector<256x128xf32>
    %2 = tpu.matmul %0, %1, %cst {dimension_numbers = #tpu.dot_dimension_numbers<[1], [0], [0], [1], [0, 0, 1, 1], [], []>} : vector<256x64xbf16>, vector<64x128xbf16>, vector<256x128xf32> -> vector<256x128xf32>
    %c0_3 = arith.constant 0 : index
    %c0_4 = arith.constant 0 : index
    %3 = vector.load %arg3[%c0_3, %c0_4] : memref<1x128xf32, #tpu.memory_space<vmem>>, vector<1x128xf32>
    %4 = vector.broadcast %3 : vector<1x128xf32> to vector<256x128xf32>
    %5 = arith.addf %2, %4 : vector<256x128xf32>
    %cst_5 = arith.constant 0.000000e+00 : f32
    %6 = vector.broadcast %cst_5 : f32 to vector<256x128xf32>
    %7 = arith.maximumf %5, %6 : vector<256x128xf32>
    %8 = arith.truncf %7 : vector<256x128xf32> to vector<256x128xbf16>
    %c0_6 = arith.constant 0 : index
    %c0_7 = arith.constant 0 : index
    %9 = vector.load %arg7[%c0_6, %c0_7] : memref<256x384xbf16, #tpu.memory_space<vmem>>, vector<256x128xbf16>
    tpu.vector_store %arg7[%c0_6, %c0_7], %8 {strides = array<i32>} : memref<256x384xbf16, #tpu.memory_space<vmem>>, vector<256x128xbf16>,
    %cst_8 = arith.constant 0.000000e+00 : bf16
    %10 = vector.broadcast %cst_8 : bf16 to vector<2x256xbf16>
    %c254 = arith.constant 254 : index
    %c128 = arith.constant 128 : index
    %11 = vector.load %arg7[%c254, %c128] : memref<256x384xbf16, #tpu.memory_space<vmem>>, vector<2x256xbf16>
    tpu.vector_store %arg7[%c254, %c128], %10 {strides = array<i32>} : memref<256x384xbf16, #tpu.memory_space<vmem>>, vector<2x256xbf16>,
    %c1 = arith.constant 1 : index
    %c0_9 = arith.constant 0 : index
    %12 = vector.load %arg7[%c1, %c0_9] : memref<256x384xbf16, #tpu.memory_space<vmem>>, vector<255x128xbf16>
    %c0_10 = arith.constant 0 : index
    %c128_11 = arith.constant 128 : index
    %13 = vector.load %arg7[%c0_10, %c128_11] : memref<256x384xbf16, #tpu.memory_space<vmem>>, vector<255x128xbf16>
    tpu.vector_store %arg7[%c0_10, %c128_11], %12 {strides = array<i32>} : memref<256x384xbf16, #tpu.memory_space<vmem>>, vector<255x128xbf16>,
    %c2 = arith.constant 2 : index
    %c0_12 = arith.constant 0 : index
    %14 = vector.load %arg7[%c2, %c0_12] : memref<256x384xbf16, #tpu.memory_space<vmem>>, vector<254x128xbf16>
    %c0_13 = arith.constant 0 : index
    %c256 = arith.constant 256 : index
    %15 = vector.load %arg7[%c0_13, %c256] : memref<256x384xbf16, #tpu.memory_space<vmem>>, vector<254x128xbf16>
    tpu.vector_store %arg7[%c0_13, %c256], %14 {strides = array<i32>} : memref<256x384xbf16, #tpu.memory_space<vmem>>, vector<254x128xbf16>,
    %c0_14 = arith.constant 0 : index
    %c0_15 = arith.constant 0 : index
    %16 = vector.load %arg7[%c0_14, %c0_15] : memref<256x384xbf16, #tpu.memory_space<vmem>>, vector<224x384xbf16>
    %c0_16 = arith.constant 0 : index
    %c0_17 = arith.constant 0 : index
    %c0_18 = arith.constant 0 : index
    %17 = vector.load %arg4[%c0_16, %c0_17, %c0_18] : memref<3x384x128xbf16, #tpu.memory_space<vmem>>, vector<1x384x128xbf16>
    %18 = vector.shape_cast %17 : vector<1x384x128xbf16> to vector<384x128xbf16>
    %cst_19 = arith.constant dense<0.000000e+00> : vector<224x128xf32>
    %19 = tpu.matmul %16, %18, %cst_19 {dimension_numbers = #tpu.dot_dimension_numbers<[1], [0], [0], [1], [0, 0, 1, 1], [], []>} : vector<224x384xbf16>, vector<384x128xbf16>, vector<224x128xf32> -> vector<224x128xf32>
    %c0_20 = arith.constant 0 : index
    %c0_21 = arith.constant 0 : index
    %20 = vector.load %arg5[%c0_20, %c0_21] : memref<1x128xf32, #tpu.memory_space<vmem>>, vector<1x128xf32>
    %21 = vector.broadcast %20 : vector<1x128xf32> to vector<224x128xf32>
    %22 = arith.addf %19, %21 : vector<224x128xf32>
    %c16 = arith.constant 16 : index
    %c0_22 = arith.constant 0 : index
    %23 = vector.load %arg7[%c16, %c0_22] : memref<256x384xbf16, #tpu.memory_space<vmem>>, vector<224x384xbf16>
    %c1_23 = arith.constant 1 : index
    %c0_24 = arith.constant 0 : index
    %c0_25 = arith.constant 0 : index
    %24 = vector.load %arg4[%c1_23, %c0_24, %c0_25] : memref<3x384x128xbf16, #tpu.memory_space<vmem>>, vector<1x384x128xbf16>
    %25 = vector.shape_cast %24 : vector<1x384x128xbf16> to vector<384x128xbf16>
    %cst_26 = arith.constant dense<0.000000e+00> : vector<224x128xf32>
    %26 = tpu.matmul %23, %25, %cst_26 {dimension_numbers = #tpu.dot_dimension_numbers<[1], [0], [0], [1], [0, 0, 1, 1], [], []>} : vector<224x384xbf16>, vector<384x128xbf16>, vector<224x128xf32> -> vector<224x128xf32>
    %27 = arith.addf %22, %26 : vector<224x128xf32>
    %c32 = arith.constant 32 : index
    %c0_27 = arith.constant 0 : index
    %28 = vector.load %arg7[%c32, %c0_27] : memref<256x384xbf16, #tpu.memory_space<vmem>>, vector<224x384xbf16>
    %c2_28 = arith.constant 2 : index
    %c0_29 = arith.constant 0 : index
    %c0_30 = arith.constant 0 : index
    %29 = vector.load %arg4[%c2_28, %c0_29, %c0_30] : memref<3x384x128xbf16, #tpu.memory_space<vmem>>, vector<1x384x128xbf16>
    %30 = vector.shape_cast %29 : vector<1x384x128xbf16> to vector<384x128xbf16>
    %cst_31 = arith.constant dense<0.000000e+00> : vector<224x128xf32>
    %31 = tpu.matmul %28, %30, %cst_31 {dimension_numbers = #tpu.dot_dimension_numbers<[1], [0], [0], [1], [0, 0, 1, 1], [], []>} : vector<224x384xbf16>, vector<384x128xbf16>, vector<224x128xf32> -> vector<224x128xf32>
    %32 = arith.addf %27, %31 : vector<224x128xf32>
    %cst_32 = arith.constant 0.000000e+00 : f32
    %33 = vector.broadcast %cst_32 : f32 to vector<224x128xf32>
    %34 = arith.maximumf %32, %33 : vector<224x128xf32>
    %c0_33 = arith.constant 0 : index
    %c0_34 = arith.constant 0 : index
    %35 = vector.load %arg8[%c0_33, %c0_34] : memref<224x128xf32, #tpu.memory_space<vmem>>, vector<224x128xf32>
    tpu.vector_store %arg8[%c0_33, %c0_34], %34 {strides = array<i32>} : memref<224x128xf32, #tpu.memory_space<vmem>>, vector<224x128xf32>,
    %c0_35 = arith.constant 0 : index
    %c0_36 = arith.constant 0 : index
    %36 = vector.load %arg8[%c0_35, %c0_36] : memref<224x128xf32, #tpu.memory_space<vmem>>, vector<16x128xf32>
    %c16_37 = arith.constant 16 : index
    %c0_38 = arith.constant 0 : index
    %37 = vector.load %arg8[%c16_37, %c0_38] : memref<224x128xf32, #tpu.memory_space<vmem>>, vector<16x128xf32>
    %38 = arith.maximumf %36, %37 : vector<16x128xf32>
    %c0_39 = arith.constant 0 : index
    %c0_40 = arith.constant 0 : index
    %39 = vector.load %arg9[%c0_39, %c0_40] : memref<112x128xf32, #tpu.memory_space<vmem>>, vector<16x128xf32>
    tpu.vector_store %arg9[%c0_39, %c0_40], %38 {strides = array<i32>} : memref<112x128xf32, #tpu.memory_space<vmem>>, vector<16x128xf32>,
    %c32_41 = arith.constant 32 : index
    %c0_42 = arith.constant 0 : index
    %40 = vector.load %arg8[%c32_41, %c0_42] : memref<224x128xf32, #tpu.memory_space<vmem>>, vector<16x128xf32>
    %c48 = arith.constant 48 : index
    %c0_43 = arith.constant 0 : index
    %41 = vector.load %arg8[%c48, %c0_43] : memref<224x128xf32, #tpu.memory_space<vmem>>, vector<16x128xf32>
    %42 = arith.maximumf %40, %41 : vector<16x128xf32>
    %c16_44 = arith.constant 16 : index
    %c0_45 = arith.constant 0 : index
    %43 = vector.load %arg9[%c16_44, %c0_45] : memref<112x128xf32, #tpu.memory_space<vmem>>, vector<16x128xf32>
    tpu.vector_store %arg9[%c16_44, %c0_45], %42 {strides = array<i32>} : memref<112x128xf32, #tpu.memory_space<vmem>>, vector<16x128xf32>,
    %c64 = arith.constant 64 : index
    %c0_46 = arith.constant 0 : index
    %44 = vector.load %arg8[%c64, %c0_46] : memref<224x128xf32, #tpu.memory_space<vmem>>, vector<16x128xf32>
    %c80 = arith.constant 80 : index
    %c0_47 = arith.constant 0 : index
    %45 = vector.load %arg8[%c80, %c0_47] : memref<224x128xf32, #tpu.memory_space<vmem>>, vector<16x128xf32>
    %46 = arith.maximumf %44, %45 : vector<16x128xf32>
    %c32_48 = arith.constant 32 : index
    %c0_49 = arith.constant 0 : index
    %47 = vector.load %arg9[%c32_48, %c0_49] : memref<112x128xf32, #tpu.memory_space<vmem>>, vector<16x128xf32>
    tpu.vector_store %arg9[%c32_48, %c0_49], %46 {strides = array<i32>} : memref<112x128xf32, #tpu.memory_space<vmem>>, vector<16x128xf32>,
    %c96 = arith.constant 96 : index
    %c0_50 = arith.constant 0 : index
    %48 = vector.load %arg8[%c96, %c0_50] : memref<224x128xf32, #tpu.memory_space<vmem>>, vector<16x128xf32>
    %c112 = arith.constant 112 : index
    %c0_51 = arith.constant 0 : index
    %49 = vector.load %arg8[%c112, %c0_51] : memref<224x128xf32, #tpu.memory_space<vmem>>, vector<16x128xf32>
    %50 = arith.maximumf %48, %49 : vector<16x128xf32>
    %c48_52 = arith.constant 48 : index
    %c0_53 = arith.constant 0 : index
    %51 = vector.load %arg9[%c48_52, %c0_53] : memref<112x128xf32, #tpu.memory_space<vmem>>, vector<16x128xf32>
    tpu.vector_store %arg9[%c48_52, %c0_53], %50 {strides = array<i32>} : memref<112x128xf32, #tpu.memory_space<vmem>>, vector<16x128xf32>,
    %c128_54 = arith.constant 128 : index
    %c0_55 = arith.constant 0 : index
    %52 = vector.load %arg8[%c128_54, %c0_55] : memref<224x128xf32, #tpu.memory_space<vmem>>, vector<16x128xf32>
    %c144 = arith.constant 144 : index
    %c0_56 = arith.constant 0 : index
    %53 = vector.load %arg8[%c144, %c0_56] : memref<224x128xf32, #tpu.memory_space<vmem>>, vector<16x128xf32>
    %54 = arith.maximumf %52, %53 : vector<16x128xf32>
    %c64_57 = arith.constant 64 : index
    %c0_58 = arith.constant 0 : index
    %55 = vector.load %arg9[%c64_57, %c0_58] : memref<112x128xf32, #tpu.memory_space<vmem>>, vector<16x128xf32>
    tpu.vector_store %arg9[%c64_57, %c0_58], %54 {strides = array<i32>} : memref<112x128xf32, #tpu.memory_space<vmem>>, vector<16x128xf32>,
    %c160 = arith.constant 160 : index
    %c0_59 = arith.constant 0 : index
    %56 = vector.load %arg8[%c160, %c0_59] : memref<224x128xf32, #tpu.memory_space<vmem>>, vector<16x128xf32>
    %c176 = arith.constant 176 : index
    %c0_60 = arith.constant 0 : index
    %57 = vector.load %arg8[%c176, %c0_60] : memref<224x128xf32, #tpu.memory_space<vmem>>, vector<16x128xf32>
    %58 = arith.maximumf %56, %57 : vector<16x128xf32>
    %c80_61 = arith.constant 80 : index
    %c0_62 = arith.constant 0 : index
    %59 = vector.load %arg9[%c80_61, %c0_62] : memref<112x128xf32, #tpu.memory_space<vmem>>, vector<16x128xf32>
    tpu.vector_store %arg9[%c80_61, %c0_62], %58 {strides = array<i32>} : memref<112x128xf32, #tpu.memory_space<vmem>>, vector<16x128xf32>,
    %c192 = arith.constant 192 : index
    %c0_63 = arith.constant 0 : index
    %60 = vector.load %arg8[%c192, %c0_63] : memref<224x128xf32, #tpu.memory_space<vmem>>, vector<16x128xf32>
    %c208 = arith.constant 208 : index
    %c0_64 = arith.constant 0 : index
    %61 = vector.load %arg8[%c208, %c0_64] : memref<224x128xf32, #tpu.memory_space<vmem>>, vector<16x128xf32>
    %62 = arith.maximumf %60, %61 : vector<16x128xf32>
    %c96_65 = arith.constant 96 : index
    %c0_66 = arith.constant 0 : index
    %63 = vector.load %arg9[%c96_65, %c0_66] : memref<112x128xf32, #tpu.memory_space<vmem>>, vector<16x128xf32>
    tpu.vector_store %arg9[%c96_65, %c0_66], %62 {strides = array<i32>} : memref<112x128xf32, #tpu.memory_space<vmem>>, vector<16x128xf32>,
    %c0_67 = arith.constant 0 : index
    %c0_68 = arith.constant 0 : index
    %64 = tpu.strided_load %arg9[%c0_67, %c0_68] {strides = array<i32: 2, 1>} : memref<112x128xf32, #tpu.memory_space<vmem>>, vector<7x128xf32>
    %c1_69 = arith.constant 1 : index
    %c0_70 = arith.constant 0 : index
    %65 = tpu.strided_load %arg9[%c1_69, %c0_70] {strides = array<i32: 2, 1>} : memref<112x128xf32, #tpu.memory_space<vmem>>, vector<7x128xf32>
    %66 = arith.maximumf %64, %65 : vector<7x128xf32>
    %c16_71 = arith.constant 16 : index
    %c0_72 = arith.constant 0 : index
    %67 = tpu.strided_load %arg9[%c16_71, %c0_72] {strides = array<i32: 2, 1>} : memref<112x128xf32, #tpu.memory_space<vmem>>, vector<7x128xf32>
    %c17 = arith.constant 17 : index
    %c0_73 = arith.constant 0 : index
    %68 = tpu.strided_load %arg9[%c17, %c0_73] {strides = array<i32: 2, 1>} : memref<112x128xf32, #tpu.memory_space<vmem>>, vector<7x128xf32>
    %69 = arith.maximumf %67, %68 : vector<7x128xf32>
    %c32_74 = arith.constant 32 : index
    %c0_75 = arith.constant 0 : index
    %70 = tpu.strided_load %arg9[%c32_74, %c0_75] {strides = array<i32: 2, 1>} : memref<112x128xf32, #tpu.memory_space<vmem>>, vector<7x128xf32>
    %c33 = arith.constant 33 : index
    %c0_76 = arith.constant 0 : index
    %71 = tpu.strided_load %arg9[%c33, %c0_76] {strides = array<i32: 2, 1>} : memref<112x128xf32, #tpu.memory_space<vmem>>, vector<7x128xf32>
    %72 = arith.maximumf %70, %71 : vector<7x128xf32>
    %c48_77 = arith.constant 48 : index
    %c0_78 = arith.constant 0 : index
    %73 = tpu.strided_load %arg9[%c48_77, %c0_78] {strides = array<i32: 2, 1>} : memref<112x128xf32, #tpu.memory_space<vmem>>, vector<7x128xf32>
    %c49 = arith.constant 49 : index
    %c0_79 = arith.constant 0 : index
    %74 = tpu.strided_load %arg9[%c49, %c0_79] {strides = array<i32: 2, 1>} : memref<112x128xf32, #tpu.memory_space<vmem>>, vector<7x128xf32>
    %75 = arith.maximumf %73, %74 : vector<7x128xf32>
    %c64_80 = arith.constant 64 : index
    %c0_81 = arith.constant 0 : index
    %76 = tpu.strided_load %arg9[%c64_80, %c0_81] {strides = array<i32: 2, 1>} : memref<112x128xf32, #tpu.memory_space<vmem>>, vector<7x128xf32>
    %c65 = arith.constant 65 : index
    %c0_82 = arith.constant 0 : index
    %77 = tpu.strided_load %arg9[%c65, %c0_82] {strides = array<i32: 2, 1>} : memref<112x128xf32, #tpu.memory_space<vmem>>, vector<7x128xf32>
    %78 = arith.maximumf %76, %77 : vector<7x128xf32>
    %c80_83 = arith.constant 80 : index
    %c0_84 = arith.constant 0 : index
    %79 = tpu.strided_load %arg9[%c80_83, %c0_84] {strides = array<i32: 2, 1>} : memref<112x128xf32, #tpu.memory_space<vmem>>, vector<7x128xf32>
    %c81 = arith.constant 81 : index
    %c0_85 = arith.constant 0 : index
    %80 = tpu.strided_load %arg9[%c81, %c0_85] {strides = array<i32: 2, 1>} : memref<112x128xf32, #tpu.memory_space<vmem>>, vector<7x128xf32>
    %81 = arith.maximumf %79, %80 : vector<7x128xf32>
    %c96_86 = arith.constant 96 : index
    %c0_87 = arith.constant 0 : index
    %82 = tpu.strided_load %arg9[%c96_86, %c0_87] {strides = array<i32: 2, 1>} : memref<112x128xf32, #tpu.memory_space<vmem>>, vector<7x128xf32>
    %c97 = arith.constant 97 : index
    %c0_88 = arith.constant 0 : index
    %83 = tpu.strided_load %arg9[%c97, %c0_88] {strides = array<i32: 2, 1>} : memref<112x128xf32, #tpu.memory_space<vmem>>, vector<7x128xf32>
    %84 = arith.maximumf %82, %83 : vector<7x128xf32>
    %85 = tpu.concatenate %66, %69, %72, %75, %78, %81, %84 in 0 : vector<7x128xf32>, vector<7x128xf32>, vector<7x128xf32>, vector<7x128xf32>, vector<7x128xf32>, vector<7x128xf32>, vector<7x128xf32> -> vector<49x128xf32>
    %c0_89 = arith.constant 0 : index
    %c0_90 = arith.constant 0 : index
    %c0_91 = arith.constant 0 : index
    %86 = vector.load %arg6[%c0_89, %c0_90, %c0_91] : memref<1x49x128xf32, #tpu.memory_space<vmem>>, vector<1x49x128xf32>
    %87 = vector.shape_cast %86 : vector<1x49x128xf32> to vector<49x128xf32>
    %88 = vector.shape_cast %85 : vector<49x128xf32> to vector<1x49x128xf32>
    tpu.vector_store %arg6[%c0_89, %c0_90, %c0_91], %88 {strides = array<i32>} : memref<1x49x128xf32, #tpu.memory_space<vmem>>, vector<1x49x128xf32>,
    return
  }
  func.func @transform_0(%arg0: i32) -> (i32, i32) {
    %c0_i32 = arith.constant 0 : i32
    %c0_i32_0 = arith.constant 0 : i32
    return %arg0, %c0_i32 : i32, i32
  }
  func.func @transform_1(%arg0: i32) -> (i32, i32) {
    %c0_i32 = arith.constant 0 : i32
    %c0_i32_0 = arith.constant 0 : i32
    %c0_i32_1 = arith.constant 0 : i32
    return %c0_i32, %c0_i32_0 : i32, i32
  }
  func.func @transform_2(%arg0: i32) -> (i32, i32) {
    %c0_i32 = arith.constant 0 : i32
    %c0_i32_0 = arith.constant 0 : i32
    %c0_i32_1 = arith.constant 0 : i32
    return %c0_i32, %c0_i32_0 : i32, i32
  }
  func.func @transform_3(%arg0: i32) -> (i32, i32, i32) {
    %c0_i32 = arith.constant 0 : i32
    %c0_i32_0 = arith.constant 0 : i32
    %c0_i32_1 = arith.constant 0 : i32
    %c0_i32_2 = arith.constant 0 : i32
    return %c0_i32, %c0_i32_0, %c0_i32_1 : i32, i32, i32
  }
  func.func @transform_4(%arg0: i32) -> (i32, i32) {
    %c0_i32 = arith.constant 0 : i32
    %c0_i32_0 = arith.constant 0 : i32
    %c0_i32_1 = arith.constant 0 : i32
    return %c0_i32, %c0_i32_0 : i32, i32
  }
  func.func @transform_5(%arg0: i32) -> (i32, i32, i32) {
    %c0_i32 = arith.constant 0 : i32
    %c0_i32_0 = arith.constant 0 : i32
    %c0_i32_1 = arith.constant 0 : i32
    return %arg0, %c0_i32, %c0_i32_0 : i32, i32, i32
  }
}

</mosaic_0001>

<bundles_post_ra>
// kernel: conv_block2_forward.1
= control target key start
LH: loop header
LB: loop body
LE: loop exit
PB: predicated region body
PF: predicated region fallthrough
CT: control target
= control target key end

     0   :  { %s5228_s18 = smov 0   ;;  %s6619_s0 = inlined_call_operand.vmem [shape: bf16[512,64], index: 0, kind: input, shape index: {}]   ;;  %s6620_s1 = inlined_call_operand.vmem [shape: bf16[64,128], index: 1, kind: input, shape index: {}]   ;;  %s6621_s2 = inlined_call_operand.vmem [shape: f32[1,128], index: 2, kind: input, shape index: {}]   ;;  %s6622_s3 = inlined_call_operand.vmem [shape: bf16[3,384,128], index: 3, kind: input, shape index: {}]   ;;  %s6623_s4 = inlined_call_operand.vmem [shape: f32[1,128], index: 4, kind: input, shape index: {}]   ;;  %s6624_s5 = inlined_call_operand.vmem [shape: f32[2,49,128], index: 5, kind: output, shape index: {}]  }
   0x1 LB: > { %s5234_s19 = sadd.s32 4294967295, %s5195_s18   ;;  %p4023_p0 = scmp.ge.s32.totalorder %s5195_s18, 1  ;;  %s5195_s18 = sphi %s5228_s18, %s15_s18  }
   0x2   : > { %p188_p1 = scmp.lt.s32.totalorder %s5195_s18, 3 }
   0x4   : > { %p189_p2 = pnand %p4023_p0, %p188_p1 }
   0x6   : > { %192 = sbr.rel (%p189_p2) target bundleno = 811 (0x32b), region = 40 }
   0xb   : > { %v4994_v0 = vld [vmem:[%s6620_s1 + $0x18] sm:$0xff]   ;;  %s4024_s22 = sshll.u32 %s5234_s19, 5  ;;  %v4995_v1 = vld [vmem:[%s6620_s1 + $0x10] sm:$0xff]   ;;  %v4996_v2 = vld [vmem:[%s6620_s1 + $0x8] sm:$0xff]   ;;  %vm379_vm0 = vcmask 523264   ;;  %vm1268_vm1 = vcmask 1042432  }
   0xc   : > { %p217_p3 = scmp.lt.s32.totalorder %s4024_s22, 63  ;;  %4812 = vmatprep.subr.bf16.mxu0 %v4994_v0  ;;  %v4997_v4 = vld [vmem:[%s6620_s1] sm:$0xff]   ;;  %v5014_v20 = vld [vmem:[%s6622_s3 + $0xb8] sm:$0xff]   ;;  %v5017_v23 = vld [vmem:[%s6622_s3 + $0xb0] sm:$0xff]   ;;  %vm1269_vm2 = vcmask 1046532   ;;  %vm1199_vm7 = vcmask 1043456  }
   0xd   : > { %4813 = vmatpush3.bf16.msra.mxu0 %v4994_v0  ;;  %v5015_v21 = vld [vmem:[%s6622_s3 + $0x78] sm:$0xff]   ;;  %v5018_v24 = vld [vmem:[%s6622_s3 + $0x70] sm:$0xff]   ;;  %v5020_v26 = vld [vmem:[%s6622_s3 + $0xa8] sm:$0xff]   ;;  %vm814_vm4 = vsmask.f32 3328  ;;  %p222_p4 = scmp.lt.s32.totalorder %s5234_s19, 1 }
   0xe   : > { %s6715_s22 = smov (!%p217_p3, %s4024_s22), 63  ;;  %4814 = vmatprep.subr.bf16.mxu0 %v4995_v1  ;;  %v5016_v22 = vld [vmem:[%s6622_s3 + $0x38] sm:$0xff]   ;;  %4446 = vmatprep.subr.bf16.mxu1 %v5015_v21  ;;  %v5019_v25 = vld [vmem:[%s6622_s3 + $0x30] sm:$0xff]   ;;  %v5021_v27 = vld [vmem:[%s6622_s3 + $0x68] sm:$0xff]   ;;  %vm815_vm5 = vsmask.f32 7440 }
   0xf   : > { %s4025_s27 = sshll.u32 %s6715_s22, 2  ;;  %4447 = vmatpush3.bf16.msra.mxu1 %v5016_v22  ;;  %v5022_v28 = vld [vmem:[%s6622_s3 + $0x28] sm:$0xff]   ;;  %v5023_v29 = vld [vmem:[%s6622_s3 + $0xa0] sm:$0xff]   ;;  %v5026_v32 = vld [vmem:[%s6622_s3 + $0x98] sm:$0xff]   ;;  %s6717_s19 = smov (!%p222_p4, %s5234_s19), 1  ;;  %vm3945_vm9 = vcmask 1046528  }
  0x10   : > { %s5251_s30 = scalar_lea.vmem %s6619_s0, %s4025_s27  ;;  %4448 = vmatprep.subr.bf16.mxu1 %v5018_v24  ;;  %v5024_v30 = vld [vmem:[%s6622_s3 + $0x60] sm:$0xff]   ;;  %v5027_v33 = vld [vmem:[%s6622_s3 + $0x58] sm:$0xff]   ;;  %v5029_v35 = vld [vmem:[%s6622_s3 + $0x90] sm:$0xff]   ;;  %s4984_s22 = smul.u32 56, %s6717_s19  ;;  %vm3947_vm10 = vcmask 1045504   ;;  %vm3949_vm11 = vcmask 1044480  }
  0x11   : > { %4815 = vmatpush3.bf16.msra.mxu0 %v4995_v1  ;;  %v4998_v3 = vld [vmem:[%s5251_s30] sm:$0xff]   ;;  %v4999_v5 = vld [vmem:[%s5251_s30 + $0x8] sm:$0xff]   ;;  %v5000_v6 = vld [vmem:[%s5251_s30 + $0x10] sm:$0xff]   ;;  %vm3955_vm12 = vcmask 1041408  }
  0x12   : > { %4816 = vmatprep.subr.bf16.mxu0 %v4996_v2  ;;  %4820 = vmatprep.mubr.msk.bf16.mxu0 %vm379_vm0, %v4998_v3  ;;  %v5001_v7 = vld [vmem:[%s5251_s30 + $0x18] sm:$0xff]   ;;  %v5002_v8 = vld [vmem:[%s5251_s30 + $0x20] sm:$0xff]   ;;  %v5003_v9 = vld [vmem:[%s5251_s30 + $0x28] sm:$0xff]   ;;  %s6588_s19 = scalar_lea.vmem %s6624_s5, %s4984_s22 }
  0x13   : > { %v5004_v10 = vld [vmem:[%s5251_s30 + $0x30] sm:$0xff]   ;;  %v5005_v11 = vld [vmem:[%s5251_s30 + $0x38] sm:$0xff]   ;;  %v5006_v12 = vld [vmem:[%s5251_s30 + $0x40] sm:$0xff]   ;;  %4449 = vmatpush3.bf16.msra.mxu1 %v5019_v25 }
  0x14   : > { %v5007_v13 = vld [vmem:[%s5251_s30 + $0x48] sm:$0xff]   ;;  %v5008_v14 = vld [vmem:[%s5251_s30 + $0x50] sm:$0xff]   ;;  %v5009_v15 = vld [vmem:[%s5251_s30 + $0x58] sm:$0xff]   ;;  %4450 = vmatprep.subr.bf16.mxu1 %v5021_v27 }
  0x15   : > { %4817 = vmatpush3.bf16.msra.mxu0 %v4996_v2  ;;  %v5010_v16 = vld [vmem:[%s5251_s30 + $0x60] sm:$0xff]   ;;  %v5011_v17 = vld [vmem:[%s5251_s30 + $0x68] sm:$0xff]   ;;  %v5012_v18 = vld [vmem:[%s5251_s30 + $0x70] sm:$0xff]  }
  0x16   : > { %4818 = vmatprep.subr.bf16.mxu0 %v4997_v4  ;;  %v5013_v19 = vld [vmem:[%s5251_s30 + $0x78] sm:$0xff]   ;;  %v5025_v31 = vld [vmem:[%s6622_s3 + $0x20] sm:$0xff]   ;;  %v5030_v36 = vld [vmem:[%s6622_s3 + $0x50] sm:$0xff]  }
  0x17   : > { %4451 = vmatpush3.bf16.msra.mxu1 %v5022_v28  ;;  %v5028_v34 = vld [vmem:[%s6622_s3 + $0x18] sm:$0xff]   ;;  %v5031_v37 = vld [vmem:[%s6622_s3 + $0x10] sm:$0xff]   ;;  %v5032_v38 = vld [vmem:[%s6622_s3 + $0x88] sm:$0xff]  }
  0x18   : > { %4452 = vmatprep.subr.bf16.mxu1 %v5024_v30  ;;  %v5033_v39 = vld [vmem:[%s6622_s3 + $0x48] sm:$0xff]   ;;  %v5035_v41 = vld [vmem:[%s6622_s3 + $0x80] sm:$0xff]   ;;  %v5363_v44 = vld [vmem:[%s6622_s3 + $0x178] sm:$0xff]  }
  0x19   : > { %4819 = vmatpush3.bf16.msra.mxu0 %v4997_v4  ;;  %v5034_v40 = vld [vmem:[%s6622_s3 + $0x8] sm:$0xff]   ;;  %v5036_v42 = vld [vmem:[%s6622_s3 + $0x40] sm:$0xff]   ;;  %6646 = vst [vmem:[#allocation5_spill] sm:$0xff] %v5363_v44  ;;  %v5059_v45 = vld [vmem:[%s6622_s3 + $0x138] sm:$0xff]  }
  0x1a   : > { %4852 = vmatprep.subr.bf16.mxu0 %v5014_v20  ;;  %v5038_v43 = vld [vmem:[%s6622_s3] sm:$0xff]   ;;  %vm5396_vm3 = vmor %vm1268_vm1, %vm1269_vm2 }
  0x1b   : > { %4453 = vmatpush3.bf16.msra.mxu1 %v5025_v31  ;;  %v5372_v46 = vld [vmem:[%s6621_s2] ss:$0 sm:$0xff]  ;;  %vm5618_vm6 = vmor %vm814_vm4, %vm815_vm5 }
  0x1c   : > { %4821 = vmatmul.mubr.msk.bf16.vlgmr.msra.gmra.mxu0 %vm379_vm0, %v4999_v5  ;;  %4454 = vmatprep.subr.bf16.mxu1 %v5027_v33  ;;  %vm1200_vm8 = vmand %vm1199_vm7, %vm814_vm4 }
  0x1d   : > { %4824 = vmatprep.mubr.msk.bf16.mxu0 %vm379_vm0, %v5000_v6  ;;  %4853 = vmatpush3.bf16.msra.mxu0 %v5014_v20 }
  0x1e   : > { %4854 = vmatprep.subr.bf16.mxu0 %v5017_v23 }
  0x1f   : > { %4455 = vmatpush3.bf16.msra.mxu1 %v5028_v34 }
  0x20   : > { %4456 = vmatprep.subr.bf16.mxu1 %v5030_v36 }
  0x21   : > { %4855 = vmatpush3.bf16.msra.mxu0 %v5017_v23 }
  0x22   : > { %4856 = vmatprep.subr.bf16.mxu0 %v5020_v26 }
  0x23   : > { %4457 = vmatpush3.bf16.msra.mxu1 %v5031_v37 }
  0x24   : > { %4825 = vmatmul.mubr.msk.bf16.gmra.mxu0 %vm379_vm0, %v5001_v7  ;;  %4458 = vmatprep.subr.bf16.mxu1 %v5033_v39 }
  0x25   : > { %4828 = vmatprep.mubr.msk.bf16.mxu0 %vm379_vm0, %v5002_v8  ;;  %4857 = vmatpush3.bf16.msra.mxu0 %v5020_v26 }
  0x26   : > { %4858 = vmatprep.subr.bf16.mxu0 %v5023_v29 }
  0x27   : > { %4459 = vmatpush3.bf16.msra.mxu1 %v5034_v40 }
  0x28   : > { %4460 = vmatprep.subr.bf16.mxu1 %v5036_v42 }
  0x29   : > { %4859 = vmatpush3.bf16.msra.mxu0 %v5023_v29 }
  0x2a   : > { %4860 = vmatprep.subr.bf16.mxu0 %v5026_v32 }
  0x2b   : > { %4461 = vmatpush3.bf16.msra.mxu1 %v5038_v43 }
  0x2c   : > { %4829 = vmatmul.mubr.msk.bf16.gmra.mxu0 %vm379_vm0, %v5003_v9  ;;  %4896 = vmatprep.subr.bf16.mxu1 %v5363_v44 }
  0x2d   : > { %4832 = vmatprep.mubr.msk.bf16.mxu0 %vm379_vm0, %v5004_v10  ;;  %4861 = vmatpush3.bf16.msra.mxu0 %v5026_v32 }
  0x2e   : > { %4862 = vmatprep.subr.bf16.mxu0 %v5029_v35 }
  0x31   : > { %4863 = vmatpush3.bf16.msra.mxu0 %v5029_v35 }
  0x32   : > { %4864 = vmatprep.subr.bf16.mxu0 %v5032_v38 }
  0x34   : > { %4833 = vmatmul.mubr.msk.bf16.gmra.mxu0 %vm379_vm0, %v5005_v11 }
  0x35   : > { %4836 = vmatprep.mubr.msk.bf16.mxu0 %vm379_vm0, %v5006_v12  ;;  %4865 = vmatpush3.bf16.msra.mxu0 %v5032_v38 }
  0x36   : > { %4866 = vmatprep.subr.bf16.mxu0 %v5035_v41 }
  0x39   : > { %4867 = vmatpush3.bf16.msra.mxu0 %v5035_v41 }
  0x3a   : > { %4568 = vmatprep.subr.bf16.mxu0 %v5059_v45 }
  0x3c   : > { %4837 = vmatmul.mubr.msk.bf16.gmra.mxu0 %vm379_vm0, %v5007_v13 }
  0x3d   : > { %4840 = vmatprep.mubr.msk.bf16.mxu0 %vm379_vm0, %v5008_v14 }
  0x44   : > { %4841 = vmatmul.mubr.msk.bf16.gmra.mxu0 %vm379_vm0, %v5009_v15 }
  0x45   : > { %4844 = vmatprep.mubr.msk.bf16.mxu0 %vm379_vm0, %v5010_v16 }
  0x4c   : > { %4845 = vmatmul.mubr.msk.bf16.gmra.mxu0 %vm379_vm0, %v5011_v17 }
  0x4d   : > { %4848 = vmatprep.mubr.msk.bf16.mxu0 %vm379_vm0, %v5012_v18 }
  0x54   : > { %4849 = vmatmul.mubr.msk.bf16.gmra.mxu0 %vm379_vm0, %v5013_v19 }
  0xdc   : > { %v4822_v47 = vpop.f32.mrf.mxu0 }
  0xdd   : > { %v471_v48 = vadd.f32 %v4822_v47, %v5372_v46 }
  0xde   : > { %v462_v49 = vpop.f32.mrf.mxu0 }
  0xdf   : > { %v591_v50 = vmax.f32 %v471_v48, 0.0  ;;  %v463_v51 = vadd.f32 %v5372_v46, %v462_v49 }
  0xe0   : > { %v4823_v52 = vpop.f32.mrf.mxu0 }
  0xe1   : > { %v4396_v53 = vpack.c.bf16 %v591_v50, %v591_v50  ;;  %v589_v54 = vmax.f32 %v463_v51, 0.0  ;;  %v474_v55 = vadd.f32 %v4823_v52, %v5372_v46 }
  0xe2   : > { %v465_v56 = vpop.f32.mrf.mxu0 }
  0xe3   : > { %751 = vst [vmem:[#allocation2 + $0x18] sm:$0xf] %v4396_v53  ;;  %v4394_v57 = vpack.c.bf16 %v589_v54, %v589_v54  ;;  %v592_v58 = vmax.f32 %v474_v55, 0.0  ;;  %v466_v59 = vadd.f32 %v5372_v46, %v465_v56 }
  0xe4   : > { %v4826_v60 = vpop.f32.mrf.mxu0 }
  0xe5   : > { %749 = vst [vmem:[#allocation2] sm:$0xf] %v4394_v57  ;;  %v4397_v61 = vpack.c.bf16 %v592_v58, %v592_v58  ;;  %v590_v62 = vmax.f32 %v466_v59, 0.0  ;;  %v487_v63 = vadd.f32 %v4826_v60, %v5372_v46 }
  0xe6   : > { %v478_v0 = vpop.f32.mrf.mxu0 }
  0xe7   : > { %752 = vst [vmem:[#allocation2 + $0x24] sm:$0xf] %v4397_v61  ;;  %v4395_v1 = vpack.c.bf16 %v590_v62, %v590_v62  ;;  %v595_v2 = vmax.f32 %v487_v63, 0.0  ;;  %v479_v3 = vadd.f32 %v5372_v46, %v478_v0 }
  0xe8   : > { %v4827_v4 = vpop.f32.mrf.mxu0 }
  0xe9   : > { %750 = vst [vmem:[#allocation2 + $0xc] sm:$0xf] %v4395_v1  ;;  %v4400_v5 = vpack.c.bf16 %v595_v2, %v595_v2  ;;  %v593_v6 = vmax.f32 %v479_v3, 0.0  ;;  %v490_v7 = vadd.f32 %v4827_v4, %v5372_v46 }
  0xea   : > { %v784_v8 = vld [vmem:[#allocation2 + $0x18] sm:$0xf]  ;;  %v481_v10 = vpop.f32.mrf.mxu0 }
  0xeb   : > { %v5381_v9 = vld [vmem:[#allocation2 + $0x18] sm:$0xf]  ;;  %v837_v11 = vshll.u32 %v784_v8, 16  ;;  %v841_v12 = vshrl.u32 %v784_v8, 16  ;;  %755 = vst [vmem:[#allocation2 + $0x48] sm:$0xf] %v4400_v5  ;;  %v4398_v14 = vpack.c.bf16 %v593_v6, %v593_v6  ;;  %v482_v38 = vadd.f32 %v5372_v46, %v481_v10 }
  0xec   : > { %v1276_v13 = vrot.slane %v5381_v9, 5  ;;  %v782_v15 = vld [vmem:[#allocation2] sm:$0xf]  ;;  %v596_v17 = vmax.f32 %v490_v7, 0.0  ;;  %v4830_v18 = vpop.f32.mrf.mxu0 }
  0xed   : > { %v5384_v16 = vld [vmem:[#allocation2] sm:$0xe]  ;;  %v5386_v19 = vrot.slane %v837_v11, 5  ;;  %v843_v20 = vrot.slane %v841_v12, 4  ;;  %v818_v22 = vshrl.u32 %v782_v15, 16  ;;  %v821_v23 = vshll.u32 %v782_v15, 16 }
  0xee   : > { %v1278_v21 = vrot.slane %v1276_v13, 4  ;;  %753 = vst [vmem:[#allocation2 + $0x30] sm:$0xf] %v4398_v14  ;;  %v4096_v24 = vrot.slane %v5384_v16, 9  ;;  %v785_v25 = vld [vmem:[#allocation2 + $0x24] sm:$0xf]  ;;  %v4401_v27 = vpack.c.bf16 %v596_v17, %v596_v17  ;;  %v494_v28 = vpop.f32.mrf.mxu0  ;;  %v503_v39 = vadd.f32 %v4830_v18, %v5372_v46 }
  0xef   : > { %v1207_v26 = vld [vmem:[#allocation2 + $0x24] sm:$0xf]  ;;  %v844_v29 = vor.u32 %v843_v20, %v5386_v19  ;;  %v5392_v30 = vrot.slane %v818_v22, 4  ;;  %v847_v31 = vshll.u32 %v785_v25, 16  ;;  %v851_v32 = vshrl.u32 %v785_v25, 16 }
  0xf0   : > { %v5400_v34 = vrot.slane %v821_v23, 5  ;;  %v1279_v35 = vrot.slane %v1207_v26, 5  ;;  %v783_v36 = vld [vmem:[#allocation2 + $0xc] sm:$0xf]  ;;  %756 = vst [vmem:[#allocation2 + $0x54] sm:$0xf] %v4401_v27  ;;  %v4831_v40 = vpop.f32.mrf.mxu0  ;;  %v495_v45 = vadd.f32 %v5372_v46, %v494_v28 }
  0xf1   : > { %v5402_v37 = vld [vmem:[#allocation2 + $0xc] sm:$0xf]  ;;  %v5406_v41 = vrot.slane %v847_v31, 5  ;;  %v853_v42 = vrot.slane %v851_v32, 4  ;;  %v827_v43 = vshll.u32 %v783_v36, 16  ;;  %v5409_v47 = vrot.slane %v844_v29, 4 }
  0xf2   : > { %v1280_v49 = vsel %vm5396_vm3, %v1278_v21, %v1279_v35  ;;  %v831_v50 = vshrl.u32 %v783_v36, 16  ;;  %v788_v51 = vld [vmem:[#allocation2 + $0x48] sm:$0xf]  ;;  %v497_v53 = vpop.f32.mrf.mxu0  ;;  %v1281_v55 = vrot.slane %v1279_v35, 4  ;;  %v1273_v56 = vrot.slane %v5402_v37, 5 }
  0xf3   : > { %v5415_v52 = vld [vmem:[#allocation2 + $0x48] sm:$0xf]  ;;  %v854_v54 = vor.u32 %v853_v42, %v5406_v41  ;;  %1400 = vst [vmem:[#allocation2 + $0x20] sm:$0xf] %v1280_v49  ;;  %v877_v57 = vshll.u32 %v788_v51, 16  ;;  %v5419_v58 = vrot.slane %v827_v43, 5  ;;  %v506_v18 = vadd.f32 %v4831_v40, %v5372_v46 }
  0xf4   : > { %v881_v59 = vshrl.u32 %v788_v51, 16  ;;  %v6629_v60 = vrot.slane %v5415_v52, 5  ;;  %v594_v62 = vmax.f32 %v482_v38, 0.0  ;;  %v4834_v63 = vpop.f32.mrf.mxu0  ;;  %v5424_v1 = vrot.slane %v831_v50, 4 }
  0xf5   : > { %v786_v61 = vld [vmem:[#allocation2 + $0x30] sm:$0xf]  ;;  %v5422_v0 = vrot.slane %v854_v54, 4  ;;  %v5426_v2 = vrot.slane %v877_v57, 5  ;;  %v5428_v5 = vrot.slane %v1273_v56, 4  ;;  %v599_v17 = vmax.f32 %v503_v39, 0.0 }
  0xf6   : > { %v857_v3 = vshll.u32 %v786_v61, 16  ;;  %v1208_v4 = vld [vmem:[#allocation2 + $0x30] sm:$0xf]  ;;  %v883_v6 = vrot.slane %v881_v59, 4  ;;  %v861_v7 = vshrl.u32 %v786_v61, 16  ;;  %v510_v10 = vpop.f32.mrf.mxu0  ;;  %v4399_v15 = vpack.c.bf16 %v594_v62, %v594_v62 }
  0xf7   : > { %v1282_v8 = vrot.slane %v1208_v4, 5  ;;  %v789_v12 = vld [vmem:[#allocation2 + $0x54] sm:$0xf]  ;;  %v5438_v21 = vrot.slane %v6629_v60, 4  ;;  %v4404_v29 = vpack.c.bf16 %v599_v17, %v599_v17  ;;  %v597_v35 = vmax.f32 %v495_v45, 0.0 }
  0xf8   : > { %v5430_v11 = vrot.slane %v857_v3, 5  ;;  %v5432_v14 = vld [vmem:[#allocation2 + $0x54] sm:$0xf]  ;;  %v884_v20 = vor.u32 %v883_v6, %v5426_v2  ;;  %v863_v22 = vrot.slane %v861_v7, 4  ;;  %v4835_v25 = vpop.f32.mrf.mxu0  ;;  %v887_v26 = vshll.u32 %v789_v12, 16 }
  0xf9   : > { %v1283_v23 = vsel %vm5396_vm3, %v1281_v55, %v1282_v8  ;;  %v891_v27 = vshrl.u32 %v789_v12, 16  ;;  %v6627_v28 = vrot.slane %v5432_v14, 5  ;;  %754 = vst [vmem:[#allocation2 + $0x3c] sm:$0xf] %v4399_v15  ;;  %v5444_v32 = vrot.slane %v1282_v8, 4 }
  0xfa   : > { %1401 = vst [vmem:[#allocation2 + $0x2c] sm:$0xf] %v1283_v23  ;;  %v864_v31 = vor.u32 %v863_v22, %v5430_v11  ;;  %v600_v36 = vmax.f32 %v506_v18, 0.0  ;;  %v513_v37 = vpop.f32.mrf.mxu0  ;;  %v5446_v38 = vrot.slane %v884_v20, 4  ;;  %v5448_v39 = vrot.slane %v887_v26, 5 }
  0xfb   : > { %v893_v40 = vrot.slane %v891_v27, 4  ;;  %759 = vst [vmem:[#allocation2 + $0x78] sm:$0xf] %v4404_v29  ;;  %v498_v42 = vadd.f32 %v5372_v46, %v497_v53  ;;  %v5453_v43 = vrot.slane %v6627_v28, 4  ;;  %v4402_v49 = vpack.c.bf16 %v597_v35, %v597_v35 }
  0xfc   : > { %v4405_v50 = vpack.c.bf16 %v600_v36, %v600_v36  ;;  %v519_v51 = vadd.f32 %v4834_v63, %v5372_v46  ;;  %v4838_v54 = vpop.f32.mrf.mxu0  ;;  %v5456_v45 = vrot.slane %v864_v31, 4  ;;  %v511_v57 = vadd.f32 %v5372_v46, %v510_v10 }
  0xfd   : > { %v598_v55 = vmax.f32 %v498_v42, 0.0  ;;  %v522_v59 = vadd.f32 %v4835_v25, %v5372_v46  ;;  %757 = vst [vmem:[#allocation2 + $0x60] sm:$0xf] %v4402_v49  ;;  %v514_v53 = vadd.f32 %v5372_v46, %v513_v37  ;;  %v535_v62 = vadd.f32 %v4838_v54, %v5372_v46 }
  0xfe   : > { %760 = vst [vmem:[#allocation2 + $0x84] sm:$0xf] %v4405_v50  ;;  %v603_v61 = vmax.f32 %v519_v51, 0.0  ;;  %v526_v3 = vpop.f32.mrf.mxu0  ;;  %v1274_v63 = vsel %vm5396_vm3, %v4096_v24, %v1273_v56  ;;  %v894_v4 = vor.u32 %v893_v40, %v5448_v39  ;;  %v601_v7 = vmax.f32 %v511_v57, 0.0 }
  0xff   : > { %v4403_v6 = vpack.c.bf16 %v598_v55, %v598_v55  ;;  %v604_v8 = vmax.f32 %v522_v59, 0.0  ;;  %1398 = vst [vmem:[#allocation2 + $0x8] sm:$0xf] %v1274_v63  ;;  %v602_v17 = vmax.f32 %v514_v53, 0.0  ;;  %v607_v18 = vmax.f32 %v535_v62, 0.0 }
 0x100   : > { %v787_v10 = vld [vmem:[#allocation2 + $0x3c] sm:$0xf]  ;;  %v4408_v15 = vpack.c.bf16 %v603_v61, %v603_v61  ;;  %v527_v20 = vadd.f32 %v5372_v46, %v526_v3  ;;  %v4839_v22 = vpop.f32.mrf.mxu0  ;;  %v4406_v24 = vpack.c.bf16 %v601_v7, %v601_v7  ;;  %v5473_v37 = vrot.slane %v894_v4, 4 }
 0x101   : > { %v5467_v12 = vld [vmem:[#allocation2 + $0x3c] sm:$0xf]  ;;  %v867_v23 = vshll.u32 %v787_v10, 16  ;;  %v871_v16 = vshrl.u32 %v787_v10, 16  ;;  %758 = vst [vmem:[#allocation2 + $0x6c] sm:$0xf] %v4403_v6  ;;  %v4409_v27 = vpack.c.bf16 %v604_v8, %v604_v8  ;;  %v4407_v29 = vpack.c.bf16 %v602_v17, %v602_v17 }
 0x102   : > { %v6630_v25 = vrot.slane %v5467_v12, 5  ;;  %v792_v56 = vld [vmem:[#allocation2 + $0x78] sm:$0xf]  ;;  %763 = vst [vmem:[#allocation2 + $0xa8] sm:$0xf] %v4408_v15  ;;  %v4412_v31 = vpack.c.bf16 %v607_v18, %v607_v18  ;;  %v605_v35 = vmax.f32 %v527_v20, 0.0  ;;  %v529_v36 = vpop.f32.mrf.mxu0  ;;  %v5490_v3 = vadd.f32 %v4839_v22, %v5372_v46 }
 0x103   : > { %v5471_v26 = vld [vmem:[#allocation2 + $0x78] sm:$0xf]  ;;  %v5475_v40 = vrot.slane %v867_v23, 5  ;;  %v873_v42 = vrot.slane %v871_v16, 4  ;;  %v917_v49 = vshll.u32 %v792_v56, 16  ;;  %v921_v51 = vshrl.u32 %v792_v56, 16 }
 0x104   : > { %761 = vst [vmem:[#allocation2 + $0x90] sm:$0xf] %v4406_v24  ;;  %v5479_v50 = vrot.slane %v6630_v25, 4  ;;  %v6625_v54 = vrot.slane %v5471_v26, 5  ;;  %764 = vst [vmem:[#allocation2 + $0xb4] sm:$0xf] %v4409_v27  ;;  %v4410_v55 = vpack.c.bf16 %v605_v35, %v605_v35  ;;  %v5482_v57 = vpop.f32.mrf.mxu0  ;;  %v1277_v63 = vsel %vm5396_vm3, %v5428_v5, %v1276_v13 }
 0x105   : > { %762 = vst [vmem:[#allocation2 + $0x9c] sm:$0xf] %v4407_v29  ;;  %767 = vst [vmem:[#allocation2 + $0xd8] sm:$0xf] %v4412_v31  ;;  %v874_v59 = vor.u32 %v873_v42, %v5475_v40  ;;  %v5485_v61 = vrot.slane %v917_v49, 5  ;;  %v923_v4 = vrot.slane %v921_v51, 4  ;;  %v5498_v10 = vadd.f32 %v5372_v46, %v529_v36 }
 0x106   : > { %v790_v53 = vld [vmem:[#allocation2 + $0x60] sm:$0xf]  ;;  %v793_v8 = vld [vmem:[#allocation2 + $0x84] sm:$0xf]  ;;  %765 = vst [vmem:[#allocation2 + $0xc0] sm:$0xf] %v4410_v55  ;;  %v5500_v15 = vpop.f32.mrf.mxu0 }
 0x107   : > { %6649 = vst [vmem:[#allocation6_spill] sm:$0xff] %v5485_v61  ;;  %v5487_v62 = vld [vmem:[#allocation2 + $0x60] sm:$0xf]  ;;  %v897_v6 = vshll.u32 %v790_v53, 16  ;;  %v901_v7 = vshrl.u32 %v790_v53, 16  ;;  %v5504_v17 = vrot.slane %v6625_v54, 4  ;;  %v924_v5 = vor.u32 %v923_v4, %v5485_v61 }
 0x108   : > { %1399 = vst [vmem:[#allocation2 + $0x14] sm:$0xf] %v1277_v63  ;;  %v6626_v9 = vrot.slane %v5487_v62, 5  ;;  %v927_v18 = vshll.u32 %v793_v8, 16  ;;  %v931_v20 = vshrl.u32 %v793_v8, 16  ;;  %v5513_v56 = vrot.slane %v874_v59, 4  ;;  %v5526_v53 = vpop.f32.mrf.mxu0 }
 0x109   : > { %v5507_v13 = vld [vmem:[#allocation2 + $0x84] sm:$0xf]  ;;  %v5510_v22 = vrot.slane %v897_v6, 5  ;;  %v903_v23 = vrot.slane %v901_v7, 4  ;;  %v791_v24 = vld [vmem:[#allocation2 + $0x6c] sm:$0xf] }
 0x10a   : > { %v6628_v16 = vrot.slane %v5507_v13, 5  ;;  %v5515_v27 = vrot.slane %v927_v18, 5  ;;  %v933_v29 = vrot.slane %v931_v20, 4  ;;  %v907_v31 = vshll.u32 %v791_v24, 16  ;;  %v5517_v35 = vld [vmem:[#allocation2 + $0x6c] sm:$0xf] }
 0x10b   : > { %v5519_v36 = vrot.slane %v924_v5, 4  ;;  %v904_v42 = vor.u32 %v903_v23, %v5510_v22  ;;  %v5524_v49 = vrot.slane %v6626_v9, 4  ;;  %v911_v51 = vshrl.u32 %v791_v24, 16  ;;  %v796_v55 = vld [vmem:[#allocation2 + $0xa8] sm:$0xf] }
 0x10c   : > { %6650 = vst [vmem:[#allocation7_spill] sm:$0xff] %v5515_v27  ;;  %v934_v59 = vor.u32 %v933_v29, %v5515_v27  ;;  %v5529_v63 = vrot.slane %v907_v31, 5  ;;  %v6631_v4 = vrot.slane %v5517_v35, 5  ;;  %v957_v6 = vshll.u32 %v796_v55, 16  ;;  %v5532_v7 = vld [vmem:[#allocation2 + $0xa8] sm:$0xf] }
 0x10d   : > { %6651 = vst [vmem:[#allocation8_spill] sm:$0xff] %v5519_v36  ;;  %6653 = vst [vmem:[#allocation10_spill] sm:$0xff] %v5532_v7  ;;  %v5536_v8 = vrot.slane %v6628_v16, 4  ;;  %v913_v18 = vrot.slane %v911_v51, 4  ;;  %v961_v20 = vshrl.u32 %v796_v55, 16  ;;  %v6634_v5 = vrot.slane %v5532_v7, 5 }
 0x10e   : > { %6652 = vst [vmem:[#allocation9_spill] sm:$0xff] %v5529_v63  ;;  %v794_v23 = vld [vmem:[#allocation2 + $0x90] sm:$0xf]  ;;  %v5539_v24 = vrot.slane %v904_v42, 4  ;;  %v5541_v54 = vrot.slane %v934_v59, 4  ;;  %v5543_v29 = vrot.slane %v957_v6, 5  ;;  %v5552_v42 = vpop.f32.mrf.mxu0 }
 0x10f   : > { %v937_v31 = vshll.u32 %v794_v23, 16  ;;  %v5545_v9 = vld [vmem:[#allocation2 + $0x90] sm:$0xf]  ;;  %v914_v28 = vor.u32 %v913_v18, %v5529_v63  ;;  %v5550_v51 = vrot.slane %v6631_v4, 4  ;;  %v963_v55 = vrot.slane %v961_v20, 4 }
 0x110   : > { %6654 = vst [vmem:[#allocation11_spill] sm:$0xff] %v5539_v24  ;;  %6655 = vst [vmem:[#allocation12_spill] sm:$0xff] %v5541_v54  ;;  %v941_v16 = vshrl.u32 %v794_v23, 16  ;;  %v797_v60 = vld [vmem:[#allocation2 + $0xb4] sm:$0xf]  ;;  %v5556_v59 = vrot.slane %v6634_v5, 4  ;;  %v5578_v20 = vpop.f32.mrf.mxu0 }
 0x111   : > { %6656 = vst [vmem:[#allocation13_spill] sm:$0xff] %v5543_v29  ;;  %v5558_v6 = vrot.slane %v937_v31, 5  ;;  %v967_v25 = vshll.u32 %v797_v60, 16  ;;  %v971_v48 = vshrl.u32 %v797_v60, 16  ;;  %v5560_v54 = vld [vmem:[#allocation2 + $0xb4] sm:$0xf]  ;;  %v964_v18 = vor.u32 %v963_v55, %v5543_v29 }
 0x112   : > { %6657 = vst [vmem:[#allocation14_spill] sm:$0xff] %v5556_v59  ;;  %6659 = vst [vmem:[#allocation16_spill] sm:$0xff] %v5560_v54  ;;  %v943_v36 = vrot.slane %v941_v16, 4  ;;  %v6637_v4 = vrot.slane %v5545_v9, 5  ;;  %v795_v23 = vld [vmem:[#allocation2 + $0x9c] sm:$0xf] }
 0x113   : > { %6658 = vst [vmem:[#allocation15_spill] sm:$0xff] %v5558_v6  ;;  %v5565_v27 = vrot.slane %v914_v28, 4  ;;  %v5567_v61 = vrot.slane %v967_v25, 5  ;;  %v973_v5 = vrot.slane %v971_v48, 4  ;;  %v947_v24 = vshll.u32 %v795_v23, 16 }
 0x114   : > { %v5569_v31 = vld [vmem:[#allocation2 + $0x9c] sm:$0xf]  ;;  %v5571_v63 = vrot.slane %v964_v18, 4  ;;  %v944_v60 = vor.u32 %v943_v36, %v5558_v6  ;;  %v5576_v16 = vrot.slane %v6637_v4, 4  ;;  %v951_v55 = vshrl.u32 %v795_v23, 16  ;;  %v558_v23 = vpop.f32.mrf.mxu0 }
 0x115   : > { %6660 = vst [vmem:[#allocation17_spill] sm:$0xff] %v5565_v27  ;;  %6661 = vst [vmem:[#allocation18_spill] sm:$0xff] %v5567_v61  ;;  %v800_v29 = vld [vmem:[#allocation2 + $0xd8] sm:$0xf]  ;;  %v974_v28 = vor.u32 %v973_v5, %v5567_v61  ;;  %v5581_v25 = vrot.slane %v947_v24, 5  ;;  %v6666_v18 = vrot.slane %v5560_v54, 5 }
 0x116   : > { %6662 = vst [vmem:[#allocation19_spill] sm:$0xff] %v5571_v63  ;;  %6663 = vst [vmem:[#allocation20_spill] sm:$0xff] %v5576_v16  ;;  %v997_v27 = vshll.u32 %v800_v29, 16  ;;  %v5584_v59 = vld [vmem:[#allocation2 + $0xd8] sm:$0xf]  ;;  %v953_v63 = vrot.slane %v951_v55, 4 }
 0x117   : > { %6664 = vst [vmem:[#allocation21_spill] sm:$0xff] %v5581_v25  ;;  %6665 = vst [vmem:[#allocation22_spill] sm:$0xff] %v5584_v59  ;;  %v5588_v36 = vrot.slane %v6666_v18, 4  ;;  %v1001_v4 = vshrl.u32 %v800_v29, 16  ;;  %v798_v6 = vld [vmem:[#allocation2 + $0xc0] sm:$0xf] }
 0x118   : > { %v5591_v7 = vrot.slane %v944_v60, 4  ;;  %v5593_v16 = vrot.slane %v974_v28, 4  ;;  %v5595_v5 = vrot.slane %v997_v27, 5  ;;  %v977_v24 = vshll.u32 %v798_v6, 16  ;;  %v5597_v48 = vld [vmem:[#allocation2 + $0xc0] sm:$0xf] }
 0x119   : > { %6667 = vst [vmem:[#allocation23_spill] sm:$0xff] %v5588_v36  ;;  %v5039_v61 = vld [vmem:[#allocation2 + $0x20] ss:$12 sps:$4 sm:$0xff]   ;;  %v954_v44 = vor.u32 %v953_v63, %v5581_v25  ;;  %v6671_v18 = vrot.slane %v5569_v31, 5  ;;  %v1003_v29 = vrot.slane %v1001_v4, 4  ;;  %v981_v55 = vshrl.u32 %v798_v6, 16 }
 0x11a   : > { %6668 = vst [vmem:[#allocation24_spill] sm:$0xff] %v5591_v7  ;;  %6669 = vst [vmem:[#allocation25_spill] sm:$0xff] %v5593_v16  ;;  %v6672_v60 = vrot.slane %v5584_v59, 5  ;;  %v5608_v28 = vrot.slane %v977_v24, 5  ;;  %v608_v27 = vmax.f32 %v5490_v3, 0.0  ;;  %v606_v16 = vmax.f32 %v5498_v10, 0.0 }
 0x11b   : > { %6670 = vst [vmem:[#allocation26_spill] sm:$0xff] %v5595_v5  ;;  %v5602_v36 = vrot.slane %v6671_v18, 4  ;;  %v1004_v54 = vor.u32 %v1003_v29, %v5595_v5  ;;  %v983_v63 = vrot.slane %v981_v55, 4  ;;  %v5037_v18 = vld [vmem:[#allocation2 + $0x8] ss:$12 sps:$4 sm:$0xff]   ;;  %v551_v4 = vadd.f32 %v5482_v57, %v5372_v46  ;;  %v5060_v3 = vld [vmem:[%s6622_s3 + $0xf8] sm:$0xff]  }
 0x11c   : > { %v5606_v7 = vrot.slane %v6672_v60, 4  ;;  %v5625_v10 = vrot.slane %v954_v44, 4  ;;  %v4413_v24 = vpack.c.bf16 %v608_v27, %v608_v27  ;;  %v4411_v29 = vpack.c.bf16 %v606_v16, %v606_v16  ;;  %v5064_v57 = vld [vmem:[%s6622_s3 + $0x130] sm:$0xff]   ;;  %4868 = vmatprep.mubr.bf16.mxu0 %v5037_v18  ;;  %v4847_v16 = vpop.f32.mrf.mxu0  ;;  %v5139_v6 = vld [vmem:[%s6622_s3 + $0x228] sm:$0xff]  }
 0x11d   : > { %v6676_v55 = vor.u32 %v5400_v34, %v5392_v30  ;;  %v5633_v25 = vrot.slane %v1004_v54, 4  ;;  %v6677_v5 = vrot.slane %v5597_v48, 5  ;;  %v611_v59 = vmax.f32 %v551_v4, 0.0  ;;  %4869 = vmatmul.mubr.bf16.vlgmr.msra.gmra.mxu0 %v5039_v61  ;;  %v6148_v33 = vld [vmem:[#allocation2 + $0xa8] ss:$12 sps:$4 sm:$0xff]  }
 0x11e   : > { %6673 = vst [vmem:[#allocation27_spill] sm:$0xff] %v5606_v7  ;;  %v834_v44 = vor.u32 %v5424_v1, %v5419_v58  ;;  %768 = vst [vmem:[#allocation2 + $0xe4] sm:$0xf] %v4413_v24  ;;  %v543_v34 = vadd.f32 %v5372_v46, %v5500_v15  ;;  %v850_v54 = vsel %vm5618_vm6, %v5409_v47, %v5406_v41  ;;  %4569 = vmatpush3.bf16.msra.mxu0 %v5060_v3  ;;  %v5065_v41 = vld [vmem:[%s6622_s3 + $0xf0] sm:$0xff]   ;;  %v5688_v4 = vpop.f32.mrf.mxu0 }
 0x11f   : > { %v825_v60 = vrot.slane %v6676_v55, 4  ;;  %v5637_v7 = vrot.slane %v6677_v5, 4  ;;  %766 = vst [vmem:[#allocation2 + $0xcc] sm:$0xf] %v4411_v29  ;;  %v860_v1 = vsel %vm5618_vm6, %v5422_v0, %v5430_v11  ;;  %v984_v5 = vor.u32 %v983_v63, %v5608_v28  ;;  %1170 = vst [vmem:[#allocation2 + $0x1c] sm:$0xf] %v850_v54  ;;  %4570 = vmatprep.subr.bf16.mxu0 %v5064_v57 }
 0x120   : > { %v4416_v61 = vpack.c.bf16 %v611_v59, %v611_v59  ;;  %v835_v27 = vrot.slane %v834_v44, 4  ;;  %1171 = vst [vmem:[#allocation2 + $0x28] sm:$0xf] %v860_v1  ;;  %v609_v47 = vmax.f32 %v543_v34, 0.0  ;;  %v6678_v15 = vrot.slane %v5467_v12, 5  ;;  %v5069_v63 = vld [vmem:[%s6622_s3 + $0x128] sm:$0xff]  }
 0x121   : > { %v830_v30 = vsel %vm5618_vm6, %v825_v60, %v5419_v58  ;;  %v554_v58 = vadd.f32 %v5526_v53, %v5372_v46  ;;  %v6679_v11 = vrot.slane %v5415_v52, 5  ;;  %v546_v53 = vadd.f32 %v5372_v46, %v5552_v42 }
 0x122   : > { %1168 = vst [vmem:[#allocation2 + $0x4] sm:$0xf] %v830_v30  ;;  %v1286_v0 = vsel %vm5396_vm3, %v5444_v32, %v6678_v15  ;;  %771 = vst [vmem:[#allocation2 + $0x108] sm:$0xf] %v4416_v61  ;;  %v840_v12 = vsel %vm5618_vm6, %v835_v27, %v5386_v19  ;;  %v6680_v52 = vrot.slane %v5432_v14, 5  ;;  %v6681_v42 = vrot.slane %v5487_v62, 5  ;;  %4571 = vmatpush3.bf16.msra.mxu0 %v5065_v41 }
 0x123   : > { %v1289_v59 = vsel %vm5396_vm3, %v5479_v50, %v6679_v11  ;;  %v612_v32 = vmax.f32 %v554_v58, 0.0  ;;  %1402 = vst [vmem:[#allocation2 + $0x38] sm:$0xf] %v1286_v0  ;;  %1169 = vst [vmem:[#allocation2 + $0x10] sm:$0xf] %v840_v12  ;;  %v4414_v3 = vpack.c.bf16 %v609_v47, %v609_v47  ;;  %v610_v19 = vmax.f32 %v546_v53, 0.0  ;;  %4572 = vmatprep.subr.bf16.mxu0 %v5069_v63 }
 0x124   : > { %1403 = vst [vmem:[#allocation2 + $0x44] sm:$0xf] %v1289_v59  ;;  %v1292_v50 = vsel %vm5396_vm3, %v5438_v21, %v6680_v52  ;;  %v1295_v18 = vsel %vm5396_vm3, %v5453_v43, %v6681_v42  ;;  %v567_v14 = vadd.f32 %v5578_v20, %v5372_v46  ;;  %v559_v24 = vadd.f32 %v5372_v46, %v558_v23  ;;  %v5070_v20 = vld [vmem:[%s6622_s3 + $0xe8] sm:$0xff]   ;;  %v5761_v42 = vld [vmem:[%s6622_s3 + $0x170] sm:$0xff]  }
 0x125   : > { %1404 = vst [vmem:[#allocation2 + $0x50] sm:$0xf] %v1292_v50  ;;  %1405 = vst [vmem:[#allocation2 + $0x5c] sm:$0xf] %v1295_v18  ;;  %v5693_v29 = vrot.slane %v984_v5, 4  ;;  %v4417_v21 = vpack.c.bf16 %v612_v32, %v612_v32  ;;  %v870_v43 = vsel %vm5618_vm6, %v5456_v45, %v5475_v40  ;;  %v880_v62 = vsel %vm5618_vm6, %v5513_v56, %v5426_v2  ;;  %v5074_v2 = vld [vmem:[%s6622_s3 + $0x120] sm:$0xff]   ;;  %v4850_v5 = vpop.f32.mrf.mxu0 }
 0x126   : > { %769 = vst [vmem:[#allocation2 + $0xf0] sm:$0xf] %v4414_v3  ;;  %v4415_v23 = vpack.c.bf16 %v610_v19, %v610_v19  ;;  %v615_v55 = vmax.f32 %v567_v14, 0.0  ;;  %v613_v60 = vmax.f32 %v559_v24, 0.0  ;;  %1172 = vst [vmem:[#allocation2 + $0x34] sm:$0xf] %v870_v43  ;;  %v5717_v30 = vadd.f32 %v4847_v16, %v5372_v46  ;;  %4573 = vmatpush3.bf16.msra.mxu0 %v5070_v20 }
 0x127   : > { %1173 = vst [vmem:[#allocation2 + $0x40] sm:$0xf] %v880_v62  ;;  %v6682_v57 = vrot.slane %v5517_v35, 5  ;;  %v801_v40 = vld [vmem:[#allocation2 + $0xe4] sm:$0xf]  ;;  %v6683_v34 = vrot.slane %v5471_v26, 5  ;;  %4574 = vmatprep.subr.bf16.mxu0 %v5074_v2  ;;  %v574_v18 = vpop.f32.mrf.mxu0  ;;  %v5770_v43 = vadd.f32 %v5372_v46, %v5688_v4  ;;  %v5773_v62 = vadd.f32 %v4850_v5, %v5372_v46 }
 0x128   : > { %v5714_v56 = vld [vmem:[#allocation2 + $0xe4] sm:$0xf]  ;;  %v799_v44 = vld [vmem:[#allocation2 + $0xcc] sm:$0xf]  ;;  %772 = vst [vmem:[#allocation2 + $0x114] sm:$0xf] %v4417_v21  ;;  %v4420_v41 = vpack.c.bf16 %v615_v55, %v615_v55  ;;  %v4418_v47 = vpack.c.bf16 %v613_v60, %v613_v60 }
 0x129   : > { %v1298_v45 = vsel %vm5396_vm3, %v5524_v49, %v6682_v57  ;;  %v1301_v35 = vsel %vm5396_vm3, %v5550_v51, %v6683_v34  ;;  %v6684_v49 = vrot.slane %v5507_v13, 5  ;;  %v6685_v1 = vrot.slane %v5545_v9, 5  ;;  %v5075_v26 = vld [vmem:[%s6622_s3 + $0xe0] sm:$0xff]   ;;  %v5738_v58 = vld [vmem:[#allocation2 + $0xcc] sm:$0xf]  ;;  %v5079_v3 = vld [vmem:[%s6622_s3 + $0xd8] sm:$0xff]  }
 0x12a   : > { %1406 = vst [vmem:[#allocation2 + $0x68] sm:$0xf] %v1298_v45  ;;  %v1007_v61 = vshll.u32 %v801_v40, 16  ;;  %v1011_v51 = vshrl.u32 %v801_v40, 16  ;;  %v1327_v27 = vrot.slane %v5714_v56, 5  ;;  %v987_v13 = vshll.u32 %v799_v44, 16  ;;  %4575 = vmatpush3.bf16.msra.mxu0 %v5075_v26 }
 0x12b   : > { %v1304_v54 = vsel %vm5396_vm3, %v5504_v17, %v6684_v49  ;;  %v1307_v16 = vsel %vm5396_vm3, %v5536_v8, %v6685_v1  ;;  %770 = vst [vmem:[#allocation2 + $0xfc] sm:$0xf] %v4415_v23  ;;  %1407 = vst [vmem:[#allocation2 + $0x74] sm:$0xf] %v1301_v35  ;;  %v5078_v17 = vld [vmem:[%s6622_s3 + $0x118] sm:$0xff]   ;;  %v991_v9 = vshrl.u32 %v799_v44, 16  ;;  %v890_v45 = vsel %vm5618_vm6, %v5446_v38, %v5448_v39 }
 0x12c   : > { %1408 = vst [vmem:[#allocation2 + $0x80] sm:$0xf] %v1304_v54  ;;  %1409 = vst [vmem:[#allocation2 + $0x8c] sm:$0xf] %v1307_v16  ;;  %v1321_v8 = vrot.slane %v5738_v58, 5  ;;  %v5744_v15 = vrot.slane %v1007_v61, 5  ;;  %v5789_v34 = vadd.f32 %v5372_v46, %v574_v18  ;;  %4576 = vmatprep.subr.bf16.mxu0 %v5078_v17  ;;  %v900_v46 = vsel %vm5618_vm6, %v5473_v37, %v5510_v22 }
 0x12d   : > { %v1013_v0 = vrot.slane %v1011_v51, 4  ;;  %v5748_v11 = vrot.slane %v1327_v27, 4  ;;  %v5750_v59 = vrot.slane %v987_v13, 5  ;;  %v804_v53 = vld [vmem:[#allocation2 + $0x108] sm:$0xf]  ;;  %v993_v63 = vrot.slane %v991_v9, 4 }
 0x12e   : > { %v5754_v12 = vrot.slane %v1321_v8, 4  ;;  %v1037_v32 = vshll.u32 %v804_v53, 16  ;;  %v1041_v52 = vshrl.u32 %v804_v53, 16  ;;  %v5756_v50 = vld [vmem:[#allocation2 + $0x108] sm:$0xf]  ;;  %v5083_v35 = vld [vmem:[%s6622_s3 + $0x110] sm:$0xff]   ;;  %4577 = vmatpush3.bf16.msra.mxu0 %v5079_v3 }
 0x12f   : > { %775 = vst [vmem:[#allocation2 + $0x138] sm:$0xf] %v4420_v41  ;;  %773 = vst [vmem:[#allocation2 + $0x120] sm:$0xf] %v4418_v47  ;;  %v1014_v19 = vor.u32 %v1013_v0, %v5744_v15  ;;  %v1336_v14 = vrot.slane %v5756_v50, 5  ;;  %v994_v20 = vor.u32 %v993_v63, %v5750_v59  ;;  %v5810_v16 = vld [vmem:[%s6622_s3 + $0x168] sm:$0xff]   ;;  %4578 = vmatprep.subr.bf16.mxu0 %v5083_v35 }
 0x130   : > { %v5040_v24 = vld [vmem:[#allocation2] ss:$12 sps:$4 sm:$0xff]   ;;  %v5042_v21 = vld [vmem:[#allocation2 + $0x4] ss:$12 sps:$4 sm:$0xff]   ;;  %v5776_v23 = vrot.slane %v1037_v32, 5  ;;  %v1043_v55 = vrot.slane %v1041_v52, 4 }
 0x131   : > { %v802_v60 = vld [vmem:[#allocation2 + $0xf0] sm:$0xf]  ;;  %v5784_v2 = vrot.slane %v1014_v19, 4  ;;  %1941 = vmatprep.mubr.bf16.mxu1 %v5042_v21  ;;  %v5786_v44 = vld [vmem:[#allocation2 + $0x1c] ss:$12 sps:$4 sm:$0xff]   ;;  %v5794_v49 = vrot.slane %v994_v20, 4 }
 0x132   : > { %v5778_v57 = vld [vmem:[#allocation2 + $0xf0] sm:$0xf]  ;;  %v1017_v4 = vshll.u32 %v802_v60, 16  ;;  %v1021_v40 = vshrl.u32 %v802_v60, 16  ;;  %1174 = vst [vmem:[#allocation2 + $0x4c] sm:$0xf] %v890_v45  ;;  %v1044_v38 = vor.u32 %v1043_v55, %v5776_v23  ;;  %1942 = vmatmul.mubr.bf16.vlgmr.msra.gmra.mxu1 %v5040_v24 }
 0x133   : > { %v5799_v39 = vrot.slane %v1336_v14, 4  ;;  %v805_v54 = vld [vmem:[#allocation2 + $0x114] sm:$0xf]  ;;  %1949 = vmatprep.mubr.bf16.mxu1 %v5786_v44  ;;  %1175 = vst [vmem:[#allocation2 + $0x58] sm:$0xf] %v900_v46  ;;  %v5088_v37 = vld [vmem:[%s6622_s3 + $0x108] sm:$0xff]  }
 0x134   : > { %v5801_v1 = vld [vmem:[#allocation2 + $0x114] sm:$0xf]  ;;  %v5816_v61 = vrot.slane %v1017_v4, 5  ;;  %v1023_v51 = vrot.slane %v1021_v40, 4  ;;  %v1047_v13 = vshll.u32 %v805_v54, 16  ;;  %v1051_v17 = vshrl.u32 %v805_v54, 16 }
 0x135   : > { %v5085_v5 = vld [vmem:[%s6622_s3 + $0xd0] sm:$0xff]   ;;  %v5822_v22 = vrot.slane %v1044_v38, 4  ;;  %v1330_v9 = vrot.slane %v5778_v57, 5  ;;  %v1339_v41 = vrot.slane %v5801_v1, 5  ;;  %v6687_v47 = vrot.slane %v5569_v31, 5  ;;  %v6688_v0 = vld [vmem:[#allocation20_spill] sm:$0xff] }
 0x136   : > { %v6686_v26 = vld [vmem:[#allocation5_spill] sm:$0xff]  ;;  %v1024_v63 = vor.u32 %v1023_v51, %v5816_v61  ;;  %v5833_v32 = vrot.slane %v1047_v13, 5  ;;  %v1053_v52 = vrot.slane %v1051_v17, 4  ;;  %v5046_v18 = vld [vmem:[#allocation2 + $0x38] ss:$12 sps:$4 sm:$0xff]   ;;  %v6691_v45 = vld [vmem:[#allocation16_spill] sm:$0xff]  ;;  %4579 = vmatpush3.bf16.msra.mxu0 %v5085_v5 }
 0x137   : > { %4897 = vmatpush3.bf16.msra.mxu1 %v6686_v26  ;;  %v1310_v53 = vsel %vm5396_vm3, %v6688_v0, %v6687_v47  ;;  %v803_v19 = vld [vmem:[#allocation2 + $0xfc] sm:$0xf]  ;;  %v5842_v31 = vrot.slane %v1330_v9, 4  ;;  %v6692_v4 = vrot.slane %v6691_v45, 5  ;;  %v5859_v54 = vrot.slane %v1339_v41, 4  ;;  %4872 = vmatprep.mubr.bf16.mxu0 %v5046_v18  ;;  %v6695_v51 = vld [vmem:[#allocation23_spill] sm:$0xff] }
 0x138   : > { %4898 = vmatprep.subr.bf16.mxu1 %v5761_v42  ;;  %v6689_v24 = vld [vmem:[#allocation10_spill] sm:$0xff]  ;;  %1410 = vst [vmem:[#allocation2 + $0x98] sm:$0xf] %v1310_v53  ;;  %v1027_v3 = vshll.u32 %v803_v19, 16  ;;  %v1031_v55 = vshrl.u32 %v803_v19, 16  ;;  %v1054_v35 = vor.u32 %v1053_v52, %v5833_v32  ;;  %v6694_v26 = vrot.slane %v5597_v48, 5  ;;  %4580 = vmatprep.subr.bf16.mxu0 %v5088_v37 }
 0x139   : > { %v6690_v21 = vrot.slane %v6689_v24, 5  ;;  %v5844_v60 = vld [vmem:[#allocation2 + $0xfc] sm:$0xf]  ;;  %v5089_v17 = vld [vmem:[%s6622_s3 + $0xc8] sm:$0xff]   ;;  %v808_v52 = vld [vmem:[#allocation2 + $0x138] sm:$0xf] }
 0x13a   : > { %v6693_v40 = vld [vmem:[#allocation14_spill] sm:$0xff]  ;;  %v1333_v46 = vrot.slane %v5844_v60, 5  ;;  %v1319_v13 = vsel %vm5396_vm3, %v6695_v51, %v6694_v26  ;;  %v5871_v47 = vrot.slane %v1027_v3, 5  ;;  %v1033_v0 = vrot.slane %v1031_v55, 4  ;;  %v6696_v18 = vld [vmem:[#allocation9_spill] sm:$0xff]  ;;  %v6697_v19 = vld [vmem:[#allocation11_spill] sm:$0xff]  ;;  %4581 = vmatpush3.bf16.msra.mxu0 %v5089_v17 }
 0x13b   : > { %v1313_v20 = vsel %vm5396_vm3, %v5602_v36, %v6690_v21  ;;  %v1316_v38 = vsel %vm5396_vm3, %v6693_v40, %v6692_v4  ;;  %v5854_v36 = vld [vmem:[%s6622_s3 + $0x160] sm:$0xff]   ;;  %4899 = vmatpush3.bf16.msra.mxu1 %v5761_v42  ;;  %v5047_v53 = vld [vmem:[#allocation2 + $0x50] ss:$12 sps:$4 sm:$0xff]   ;;  %1413 = vst [vmem:[#allocation2 + $0xbc] sm:$0xf] %v1319_v13  ;;  %v910_v48 = vsel %vm5618_vm6, %v6697_v19, %v6696_v18  ;;  %v5885_v3 = vrot.slane %v1024_v63, 4 }
 0x13c   : > { %1411 = vst [vmem:[#allocation2 + $0xa4] sm:$0xf] %v1313_v20  ;;  %1412 = vst [vmem:[#allocation2 + $0xb0] sm:$0xf] %v1316_v38  ;;  %v6698_v42 = vld [vmem:[#allocation6_spill] sm:$0xff]  ;;  %v6699_v24 = vld [vmem:[#allocation17_spill] sm:$0xff]  ;;  %4900 = vmatprep.subr.bf16.mxu1 %v5810_v16  ;;  %v1034_v38 = vor.u32 %v1033_v0, %v5871_v47  ;;  %4873 = vmatmul.mubr.bf16.gmra.mxu0 %v5047_v53 }
 0x13d   : > { %v920_v21 = vsel %vm5618_vm6, %v6699_v24, %v6698_v42  ;;  %v5093_v20 = vld [vmem:[%s6622_s3 + $0x100] sm:$0xff]   ;;  %v5887_v55 = vrot.slane %v1054_v35, 4  ;;  %v1077_v45 = vshll.u32 %v808_v52, 16  ;;  %v1081_v4 = vshrl.u32 %v808_v52, 16  ;;  %v5889_v40 = vld [vmem:[#allocation2 + $0x138] sm:$0xf] }
 0x13e   : > { %1176 = vst [vmem:[#allocation2 + $0x64] sm:$0xf] %v910_v48  ;;  %1177 = vst [vmem:[#allocation2 + $0x70] sm:$0xf] %v920_v21  ;;  %v1348_v5 = vrot.slane %v5889_v40, 5  ;;  %v616_v63 = vmax.f32 %v5717_v30, 0.0  ;;  %v1322_v35 = vsel %vm5396_vm3, %v5637_v7, %v1321_v8  ;;  %4582 = vmatprep.subr.bf16.mxu0 %v5093_v20 }
 0x13f   : > { %v5893_v26 = vld [vmem:[#allocation2 + $0x18] ss:$12 sps:$4 sm:$0xff]   ;;  %v806_v51 = vld [vmem:[#allocation2 + $0x120] sm:$0xf]  ;;  %v5906_v13 = vrot.slane %v1077_v45, 5  ;;  %v1083_v0 = vrot.slane %v1081_v4, 4  ;;  %4901 = vmatpush3.bf16.msra.mxu1 %v5810_v16 }
 0x140   : > { %v5904_v37 = vld [vmem:[%s6622_s3 + $0x158] sm:$0xff]   ;;  %v1057_v53 = vshll.u32 %v806_v51, 16  ;;  %v1061_v52 = vshrl.u32 %v806_v51, 16  ;;  %v1228_v18 = vld [vmem:[#allocation2 + $0x120] sm:$0xf]  ;;  %v5912_v58 = vrot.slane %v1034_v38, 4  ;;  %1950 = vmatmul.mubr.bf16.gmra.mxu1 %v5893_v26  ;;  %v4421_v48 = vpack.c.bf16 %v616_v63, %v616_v63  ;;  %4902 = vmatprep.subr.bf16.mxu1 %v5854_v36 }
 0x141   : > { %1414 = vst [vmem:[#allocation2 + $0xc8] sm:$0xf] %v1322_v35  ;;  %v5094_v30 = vld [vmem:[%s6622_s3 + $0xc0] sm:$0xff]   ;;  %v1335_v7 = vrot.slane %v1333_v46, 4  ;;  %v5918_v8 = vrot.slane %v1348_v5, 4  ;;  %v6700_v24 = vld [vmem:[#allocation22_spill] sm:$0xff]  ;;  %v1084_v17 = vor.u32 %v1083_v0, %v5906_v13 }
 0x142   : > { %v5921_v19 = vld [vmem:[#allocation2 + $0x34] ss:$12 sps:$4 sm:$0xff]   ;;  %v5924_v16 = vrot.slane %v1057_v53, 5  ;;  %v1063_v42 = vrot.slane %v1061_v52, 4  ;;  %v6701_v21 = vrot.slane %v6700_v24, 5  ;;  %v1342_v4 = vrot.slane %v1228_v18, 5  ;;  %4583 = vmatpush3.bf16.msra.mxu0 %v5094_v30 }
 0x143   : > { %1957 = vmatprep.mubr.bf16.mxu1 %v5921_v19  ;;  %776 = vst [vmem:[#allocation2 + $0x144] sm:$0xf] %v4421_v48  ;;  %v5051_v38 = vld [vmem:[#allocation2 + $0x68] ss:$12 sps:$4 sm:$0xff]   ;;  %v614_v51 = vmax.f32 %v5770_v43, 0.0  ;;  %v6702_v63 = vld [vmem:[#allocation27_spill] sm:$0xff]  ;;  %4903 = vmatpush3.bf16.msra.mxu1 %v5854_v36  ;;  %v1334_v36 = vsel %vm5396_vm3, %v5842_v31, %v1333_v46  ;;  %v1337_v60 = vsel %vm5396_vm3, %v1335_v7, %v1336_v14 }
 0x144   : > { %v1325_v45 = vsel %vm5396_vm3, %v5754_v12, %v6701_v21  ;;  %v1328_v35 = vsel %vm5396_vm3, %v6702_v63, %v1327_v27  ;;  %v1331_v12 = vsel %vm5396_vm3, %v5748_v11, %v1330_v9  ;;  %v1064_v53 = vor.u32 %v1063_v42, %v5924_v16  ;;  %v5052_v52 = vld [vmem:[#allocation2 + $0x80] ss:$12 sps:$4 sm:$0xff]   ;;  %v5954_v11 = vld [vmem:[%s6622_s3 + $0x150] sm:$0xff]   ;;  %4876 = vmatprep.mubr.bf16.mxu0 %v5051_v38  ;;  %v5972_v42 = vld [vmem:[%s6622_s3 + $0x238] sm:$0xff]  }
 0x145   : > { %1415 = vst [vmem:[#allocation2 + $0xd4] sm:$0xf] %v1325_v45  ;;  %v619_v43 = vmax.f32 %v5773_v62, 0.0  ;;  %1416 = vst [vmem:[#allocation2 + $0xe0] sm:$0xf] %v1328_v35  ;;  %v6703_v56 = vld [vmem:[#allocation7_spill] sm:$0xff]  ;;  %v4419_v57 = vpack.c.bf16 %v614_v51, %v614_v51  ;;  %4904 = vmatprep.subr.bf16.mxu1 %v5904_v37  ;;  %v1340_v31 = vsel %vm5396_vm3, %v5799_v39, %v1339_v41  ;;  %4877 = vmatmul.mubr.bf16.gmra.mxu0 %v5052_v52  ;;  %v4851_v41 = vpop.f32.mrf.mxu0 }
 0x146   : > { %1417 = vst [vmem:[#allocation2 + $0xec] sm:$0xf] %v1331_v12  ;;  %v6704_v18 = vld [vmem:[#allocation8_spill] sm:$0xff]  ;;  %v5956_v9 = vld [vmem:[#allocation2 + $0x30] ss:$12 sps:$4 sm:$0xff]   ;;  %v617_v62 = vmax.f32 %v5789_v34, 0.0  ;;  %v1343_v50 = vsel %vm5396_vm3, %v5859_v54, %v1342_v4  ;;  %4940 = vmatprep.subr.bf16.mxu0 %v5972_v42 }
 0x147   : > { %v930_v27 = vsel %vm5618_vm6, %v6704_v18, %v6703_v56  ;;  %v6705_v20 = vld [vmem:[#allocation15_spill] sm:$0xff]  ;;  %v6706_v0 = vld [vmem:[#allocation12_spill] sm:$0xff]  ;;  %v5974_v34 = vrot.slane %v1342_v4, 4  ;;  %v4424_v24 = vpack.c.bf16 %v619_v43, %v619_v43  ;;  %1418 = vst [vmem:[#allocation2 + $0xf8] sm:$0xf] %v1334_v36  ;;  %v6707_v45 = vld [vmem:[#allocation21_spill] sm:$0xff]  ;;  %4905 = vmatpush3.bf16.msra.mxu1 %v5904_v37  ;;  %v1010_v37 = vsel %vm5618_vm6, %v5633_v25, %v5744_v15 }
 0x148   : > { %v940_v48 = vsel %vm5618_vm6, %v6706_v0, %v6705_v20  ;;  %1178 = vst [vmem:[#allocation2 + $0x7c] sm:$0xf] %v930_v27  ;;  %774 = vst [vmem:[#allocation2 + $0x12c] sm:$0xf] %v4419_v57  ;;  %v4422_v46 = vpack.c.bf16 %v617_v62, %v617_v62  ;;  %v5057_v21 = vld [vmem:[#allocation2 + $0x98] ss:$12 sps:$4 sm:$0xff]   ;;  %1958 = vmatmul.mubr.bf16.gmra.mxu1 %v5956_v9  ;;  %4906 = vmatprep.subr.bf16.mxu1 %v5954_v11 }
 0x149   : > { %1179 = vst [vmem:[#allocation2 + $0x88] sm:$0xf] %v940_v48  ;;  %1419 = vst [vmem:[#allocation2 + $0x104] sm:$0xf] %v1337_v60  ;;  %v6708_v14 = vld [vmem:[#allocation24_spill] sm:$0xff]  ;;  %v6709_v7 = vld [vmem:[#allocation13_spill] sm:$0xff]  ;;  %4880 = vmatprep.mubr.bf16.mxu0 %v5057_v21  ;;  %v1030_v25 = vsel %vm5618_vm6, %v5885_v3, %v5871_v47  ;;  %v1040_v15 = vsel %vm5618_vm6, %v5912_v58, %v5776_v23  ;;  %v1050_v23 = vsel %vm5618_vm6, %v5822_v22, %v5833_v32  ;;  %v577_v48 = vpop.f32.mrf.mxu0 }
 0x14a   : > { %1420 = vst [vmem:[#allocation2 + $0x110] sm:$0xf] %v1340_v31  ;;  %v950_v1 = vsel %vm5618_vm6, %v6708_v14, %v6707_v45  ;;  %v960_v39 = vsel %vm5618_vm6, %v5625_v10, %v6709_v7  ;;  %v5996_v30 = vrot.slane %v1084_v17, 4  ;;  %779 = vst [vmem:[#allocation2 + $0x168] sm:$0xf] %v4424_v24  ;;  %v6710_v54 = vld [vmem:[#allocation18_spill] sm:$0xff]  ;;  %v1060_v47 = vsel %vm5618_vm6, %v5887_v55, %v5924_v16 }
 0x14b   : > { %v5998_v38 = vld [vmem:[#allocation2 + $0x4c] ss:$12 sps:$4 sm:$0xff]   ;;  %1421 = vst [vmem:[#allocation2 + $0x11c] sm:$0xf] %v1343_v50  ;;  %1180 = vst [vmem:[#allocation2 + $0x94] sm:$0xf] %v950_v1  ;;  %4907 = vmatpush3.bf16.msra.mxu1 %v5954_v11 }
 0x14c   : > { %1181 = vst [vmem:[#allocation2 + $0xa0] sm:$0xf] %v960_v39  ;;  %v6711_v4 = vld [vmem:[#allocation19_spill] sm:$0xff]  ;;  %v6712_v63 = vld [vmem:[#allocation25_spill] sm:$0xff]  ;;  %v6015_v17 = vrot.slane %v1064_v53, 4  ;;  %v6713_v52 = vld [vmem:[#allocation26_spill] sm:$0xff]  ;;  %1965 = vmatprep.mubr.bf16.mxu1 %v5998_v38 }
 0x14d   : > { %v970_v51 = vsel %vm5618_vm6, %v6711_v4, %v6710_v54  ;;  %v980_v35 = vsel %vm5618_vm6, %v6712_v63, %v5608_v28  ;;  %v6011_v10 = vld [vmem:[%s6621_s2] ss:$0 sm:$0xff]  ;;  %777 = vst [vmem:[#allocation2 + $0x150] sm:$0xf] %v4422_v46  ;;  %v990_v28 = vsel %vm5618_vm6, %v5693_v29, %v5750_v59  ;;  %v1000_v43 = vsel %vm5618_vm6, %v5794_v49, %v6713_v52  ;;  %v5109_v53 = vld [vmem:[%s6622_s3 + $0x148] sm:$0xff]  }
 0x14e   : > { %v586_v12 = vadd.f32 %v6011_v10, %v4851_v41  ;;  %1182 = vst [vmem:[#allocation2 + $0xac] sm:$0xf] %v970_v51  ;;  %1183 = vst [vmem:[#allocation2 + $0xb8] sm:$0xf] %v980_v35  ;;  %v809_v56 = vld [vmem:[#allocation2 + $0x144] sm:$0xf]  ;;  %v1020_v29 = vsel %vm5618_vm6, %v5784_v2, %v5816_v61  ;;  %4908 = vmatprep.subr.bf16.mxu1 %v5109_v53  ;;  %v578_v14 = vadd.f32 %v6011_v10, %v577_v48 }
 0x14f   : > { %v1231_v18 = vld [vmem:[#allocation2 + $0x144] sm:$0xf]  ;;  %1184 = vst [vmem:[#allocation2 + $0xc4] sm:$0xf] %v990_v28  ;;  %1185 = vst [vmem:[#allocation2 + $0xd0] sm:$0xf] %v1000_v43  ;;  %4909 = vmatpush3.bf16.msra.mxu1 %v5109_v53 }
 0x150   : > { %1186 = vst [vmem:[#allocation2 + $0xdc] sm:$0xf] %v1010_v37  ;;  %v1087_v59 = vshll.u32 %v809_v56, 16  ;;  %v1091_v49 = vshrl.u32 %v809_v56, 16  ;;  %v1351_v27 = vrot.slane %v1231_v18, 5  ;;  %v620_v62 = vmax.f32 %v586_v12, 0.0 }
 0x151   : > { %v5058_v57 = vld [vmem:[#allocation2 + $0xb0] ss:$12 sps:$4 sm:$0xff]   ;;  %1187 = vst [vmem:[#allocation2 + $0xe8] sm:$0xf] %v1020_v29  ;;  %1188 = vst [vmem:[#allocation2 + $0xf4] sm:$0xf] %v1030_v25 }
 0x152   : > { %1189 = vst [vmem:[#allocation2 + $0x100] sm:$0xf] %v1040_v15  ;;  %v5116_v2 = vld [vmem:[%s6622_s3 + $0x140] sm:$0xff]   ;;  %v5067_v61 = vld [vmem:[#allocation2 + $0xc8] ss:$12 sps:$4 sm:$0xff]   ;;  %v1089_v3 = vrot.slane %v1087_v59, 5  ;;  %v1352_v0 = vsel %vm5396_vm3, %v5918_v8, %v1351_v27  ;;  %v4425_v32 = vpack.c.bf16 %v620_v62, %v620_v62  ;;  %4881 = vmatmul.mubr.bf16.gmra.mxu0 %v5058_v57 }
 0x153   : > { %v1093_v58 = vrot.slane %v1091_v49, 4  ;;  %v6060_v20 = vld [vmem:[#allocation2 + $0x48] ss:$12 sps:$4 sm:$0xff]   ;;  %1190 = vst [vmem:[#allocation2 + $0x10c] sm:$0xf] %v1050_v23  ;;  %v5119_v8 = vld [vmem:[%s6622_s3 + $0x1f8] sm:$0xff]   ;;  %4884 = vmatprep.mubr.bf16.mxu0 %v5067_v61  ;;  %4910 = vmatprep.subr.bf16.mxu1 %v5116_v2 }
 0x154   : > { %1191 = vst [vmem:[#allocation2 + $0x118] sm:$0xf] %v1060_v47  ;;  %v807_v11 = vld [vmem:[#allocation2 + $0x12c] sm:$0xf]  ;;  %v6065_v22 = vld [vmem:[#allocation2 + $0x64] ss:$12 sps:$4 sm:$0xff]   ;;  %v1090_v1 = vsel %vm5618_vm6, %v5996_v30, %v1089_v3  ;;  %1966 = vmatmul.mubr.bf16.gmra.mxu1 %v6060_v20 }
 0x155   : > { %v1229_v36 = vld [vmem:[#allocation2 + $0x12c] sm:$0xf]  ;;  %1424 = vst [vmem:[#allocation2 + $0x140] sm:$0xf] %v1352_v0  ;;  %v1094_v24 = vor.u32 %v1093_v58, %v1089_v3  ;;  %v1067_v55 = vshll.u32 %v807_v11, 16  ;;  %v1071_v16 = vshrl.u32 %v807_v11, 16  ;;  %1973 = vmatprep.mubr.bf16.mxu1 %v6065_v22  ;;  %4911 = vmatpush3.bf16.msra.mxu1 %v5116_v2 }
 0x156   : > { %v1345_v60 = vrot.slane %v1229_v36, 5  ;;  %v812_v31 = vld [vmem:[#allocation2 + $0x168] sm:$0xf]  ;;  %v810_v45 = vld [vmem:[#allocation2 + $0x150] sm:$0xf]  ;;  %v1353_v7 = vrot.slane %v1351_v27, 4  ;;  %4690 = vmatprep.subr.bf16.mxu1 %v5119_v8 }
 0x157   : > { %v1117_v46 = vshll.u32 %v812_v31, 16  ;;  %v1121_v21 = vshrl.u32 %v812_v31, 16  ;;  %v6070_v50 = vld [vmem:[#allocation2 + $0x168] sm:$0xf]  ;;  %780 = vst [vmem:[#allocation2 + $0x174] sm:$0xf] %v4425_v32 }
 0x158   : > { %v1069_v39 = vrot.slane %v1067_v55, 5  ;;  %v1073_v41 = vrot.slane %v1071_v16, 4  ;;  %v1347_v54 = vrot.slane %v1345_v60, 4  ;;  %v6076_v4 = vld [vmem:[#allocation2 + $0x150] sm:$0xf]  ;;  %v1095_v63 = vrot.slane %v1094_v24, 4 }
 0x159   : > { %v5068_v51 = vld [vmem:[#allocation2 + $0xe0] ss:$12 sps:$4 sm:$0xff]   ;;  %1194 = vst [vmem:[#allocation2 + $0x13c] sm:$0xf] %v1090_v1  ;;  %v6079_v35 = vrot.slane %v1117_v46, 5  ;;  %v1123_v10 = vrot.slane %v1121_v21, 4  ;;  %v1346_v37 = vsel %vm5396_vm3, %v5974_v34, %v1345_v60 }
 0x15a   : > { %v1097_v12 = vshll.u32 %v810_v45, 16  ;;  %v1074_v28 = vor.u32 %v1073_v41, %v1069_v39  ;;  %v1360_v30 = vrot.slane %v6070_v50, 5  ;;  %v1354_v52 = vrot.slane %v6076_v4, 5  ;;  %v5076_v43 = vld [vmem:[#allocation2 + $0xf8] ss:$12 sps:$4 sm:$0xff]   ;;  %4885 = vmatmul.mubr.bf16.gmra.mxu0 %v5068_v51 }
 0x15b   : > { %v1349_v56 = vsel %vm5396_vm3, %v1347_v54, %v1348_v5  ;;  %1422 = vst [vmem:[#allocation2 + $0x128] sm:$0xf] %v1346_v37  ;;  %v1124_v29 = vor.u32 %v1123_v10, %v6079_v35  ;;  %v6094_v15 = vld [vmem:[#allocation2 + $0x60] ss:$12 sps:$4 sm:$0xff]   ;;  %v6096_v59 = vld [vmem:[#allocation2 + $0x7c] ss:$12 sps:$4 sm:$0xff]   ;;  %v1070_v40 = vsel %vm5618_vm6, %v6015_v17, %v1069_v39  ;;  %4888 = vmatprep.mubr.bf16.mxu0 %v5076_v43 }
 0x15c   : > { %v1099_v53 = vrot.slane %v1097_v12, 5  ;;  %v1075_v18 = vrot.slane %v1074_v28, 4  ;;  %1423 = vst [vmem:[#allocation2 + $0x134] sm:$0xf] %v1349_v56  ;;  %v1355_v25 = vsel %vm5396_vm3, %v1353_v7, %v1354_v52  ;;  %v1362_v34 = vrot.slane %v1360_v30, 4  ;;  %1974 = vmatmul.mubr.bf16.gmra.mxu1 %v6094_v15  ;;  %v5154_v37 = vld [vmem:[%s6622_s3 + $0x208] sm:$0xff]  }
 0x15d   : > { %1425 = vst [vmem:[#allocation2 + $0x14c] sm:$0xf] %v1355_v25  ;;  %v618_v49 = vmax.f32 %v578_v14, 0.0  ;;  %1192 = vst [vmem:[#allocation2 + $0x124] sm:$0xf] %v1070_v40  ;;  %v1101_v57 = vshrl.u32 %v810_v45, 16  ;;  %1981 = vmatprep.mubr.bf16.mxu1 %v6096_v59 }
 0x15e   : > { %v1100_v5 = vsel %vm5618_vm6, %v1095_v63, %v1099_v53  ;;  %v1080_v27 = vsel %vm5618_vm6, %v1075_v18, %v5906_v13  ;;  %v6108_v62 = vld [vmem:[#allocation2 + $0x174] sm:$0xf]  ;;  %v1125_v17 = vrot.slane %v1124_v29, 4  ;;  %v5077_v47 = vld [vmem:[#allocation2 + $0x110] ss:$12 sps:$4 sm:$0xff]   ;;  %v5197_v48 = vmov 0  }
 0x15f   : > { %1195 = vst [vmem:[#allocation2 + $0x148] sm:$0xf] %v1100_v5  ;;  %v1235_v2 = vld [vmem:[#allocation2 + $0x174] sm:$0xf]  ;;  %1193 = vst [vmem:[#allocation2 + $0x130] sm:$0xf] %v1080_v27  ;;  %v4423_v3 = vpack.c.bf16 %v618_v49, %v618_v49 }
 0x160   : > { %v1127_v61 = vshll.u32 %v6108_v62, 16  ;;  %v1363_v23 = vrot.slane %v1235_v2, 5  ;;  %781 = vst [vmem:[#allocation2 + $0x178] sm:$0x88] %v5197_v48  ;;  %v1103_v11 = vrot.slane %v1101_v57, 4  ;;  %v1356_v60 = vrot.slane %v1354_v52, 4 }
 0x161   : > { %778 = vst [vmem:[#allocation2 + $0x15c] sm:$0xf] %v4423_v3  ;;  %v6120_v24 = vld [vmem:[#allocation2 + $0x78] ss:$12 sps:$4 sm:$0xff]   ;;  %v6122_v16 = vld [vmem:[#allocation2 + $0x94] ss:$12 sps:$4 sm:$0xff]  }
 0x162   : > { %v6113_v58 = vrot.slane %v1127_v61, 5  ;;  %v1364_v13 = vsel %vm5396_vm3, %v1362_v34, %v1363_v23  ;;  %v1365_v0 = vrot.slane %v1363_v23, 4  ;;  %4889 = vmatmul.mubr.bf16.gmra.mxu0 %v5077_v47  ;;  %v1104_v55 = vor.u32 %v1103_v11, %v1099_v53  ;;  %v6128_v4 = vld [vmem:[#allocation2 + $0x90] ss:$12 sps:$4 sm:$0xff]   ;;  %v6131_v51 = vld [vmem:[#allocation2 + $0xac] ss:$12 sps:$4 sm:$0xff]  }
 0x163   : > { %v5086_v36 = vld [vmem:[#allocation2 + $0x128] ss:$12 sps:$4 sm:$0xff]   ;;  %1428 = vst [vmem:[#allocation2 + $0x170] sm:$0xf] %v1364_v13  ;;  %v6151_v50 = vld [vmem:[#allocation2 + $0xc4] ss:$12 sps:$4 sm:$0xff]  }
 0x164   : > { %1429 = vst [vmem:[#allocation2 + $0x17c] sm:$0x7] %v1365_v0  ;;  %v1130_v32 = vsel %vm5618_vm6, %v1125_v17, %v6113_v58  ;;  %4892 = vmatprep.mubr.bf16.mxu0 %v5086_v36  ;;  %1982 = vmatmul.mubr.bf16.gmra.mxu1 %v6120_v24  ;;  %v5087_v31 = vld [vmem:[#allocation2 + $0x140] ss:$12 sps:$4 sm:$0xff]   ;;  %v1105_v21 = vrot.slane %v1104_v55, 4  ;;  %v5130_v52 = vld [vmem:[%s6622_s3 + $0x230] sm:$0xff]  }
 0x165   : > { %1198 = vst [vmem:[#allocation2 + $0x16c] sm:$0xf] %v1130_v32  ;;  %1989 = vmatprep.mubr.bf16.mxu1 %v6122_v16  ;;  %v6181_v43 = vld [vmem:[#allocation2 + $0xf4] ss:$12 sps:$4 sm:$0xff]   ;;  %v6193_v56 = vld [vmem:[#allocation2 + $0xf0] ss:$12 sps:$4 sm:$0xff]  }
 0x166   : > { %v6196_v18 = vld [vmem:[#allocation2 + $0x10c] ss:$12 sps:$4 sm:$0xff]   ;;  %v6206_v40 = vld [vmem:[#allocation2 + $0x124] ss:$12 sps:$4 sm:$0xff]   ;;  %v6214_v34 = vld [vmem:[#allocation2 + $0x13c] ss:$12 sps:$4 sm:$0xff]  }
 0x167   : > { %v1201_v25 = vld [vmem:[#allocation2 + $0x178] sm:$0xf]  ;;  %v6211_v5 = vld [vmem:[#allocation2 + $0x120] ss:$12 sps:$4 sm:$0xff]   ;;  %v5124_v2 = vld [vmem:[%s6622_s3 + $0x1f0] sm:$0xff]  }
 0x168   : > { %v811_v8 = vld [vmem:[#allocation2 + $0x15c] sm:$0xf]  ;;  %v6219_v49 = vld [vmem:[#allocation2 + $0x138] ss:$12 sps:$4 sm:$0xff]   ;;  %v5118_v27 = vld [vmem:[#allocation2 + $0x20] ss:$12 sps:$4 sm:$0xff]  }
 0x169   : > { %v1233_v46 = vld [vmem:[#allocation2 + $0x15c] sm:$0xf]  ;;  %v1107_v45 = vshll.u32 %v811_v8, 16  ;;  %v1111_v14 = vshrl.u32 %v811_v8, 16  ;;  %v5125_v61 = vld [vmem:[%s6622_s3 + $0x1b0] sm:$0xff]   ;;  %v5128_v23 = vld [vmem:[%s6622_s3 + $0x1e8] sm:$0xff]  }
 0x16a   : > { %v1357_v1 = vrot.slane %v1233_v46, 5  ;;  %4893 = vmatmul.mubr.bf16.gmra.mxu0 %v5087_v31  ;;  %v5121_v57 = vld [vmem:[%s6622_s3 + $0x1b8] sm:$0xff]   ;;  %v5129_v47 = vld [vmem:[%s6622_s3 + $0x1a8] sm:$0xff]   ;;  %v5134_v0 = vld [vmem:[%s6622_s3 + $0x1a0] sm:$0xff]  }
 0x16b   : > { %v1109_v7 = vrot.slane %v1107_v45, 5  ;;  %v1113_v39 = vrot.slane %v1111_v14, 4  ;;  %2704 = vmatprep.mubr.bf16.mxu0 %v5786_v44  ;;  %v5122_v17 = vld [vmem:[#allocation2 + $0x50] ss:$12 sps:$4 sm:$0xff]   ;;  %v5126_v3 = vld [vmem:[#allocation2 + $0x68] ss:$12 sps:$4 sm:$0xff]  }
 0x16c   : > { %v1359_v41 = vrot.slane %v1357_v1, 4  ;;  %v1358_v54 = vsel %vm5396_vm3, %v1356_v60, %v1357_v1  ;;  %1990 = vmatmul.mubr.bf16.gmra.mxu1 %v6128_v4  ;;  %v5127_v13 = vld [vmem:[#allocation2 + $0x80] ss:$12 sps:$4 sm:$0xff]   ;;  %v5137_v48 = vld [vmem:[%s6622_s3 + $0x1d8] sm:$0xff]   ;;  %v5143_v32 = vld [vmem:[%s6622_s3 + $0x1d0] sm:$0xff]  }
 0x16d   : > { %1426 = vst [vmem:[#allocation2 + $0x158] sm:$0xf] %v1358_v54  ;;  %v1114_v63 = vor.u32 %v1113_v39, %v1109_v7  ;;  %v1110_v10 = vsel %vm5618_vm6, %v1105_v21, %v1109_v7  ;;  %1997 = vmatprep.mubr.bf16.mxu1 %v6131_v51  ;;  %v5138_v11 = vld [vmem:[%s6622_s3 + $0x198] sm:$0xff]   ;;  %v5144_v55 = vld [vmem:[%s6622_s3 + $0x190] sm:$0xff]   ;;  %v5151_v60 = vld [vmem:[%s6622_s3 + $0x1c8] sm:$0xff]  }
 0x16e   : > { %v1361_v12 = vsel %vm5396_vm3, %v1359_v41, %v1360_v30  ;;  %1196 = vst [vmem:[#allocation2 + $0x154] sm:$0xf] %v1110_v10  ;;  %v6178_v30 = vld [vmem:[#allocation2 + $0xd8] ss:$12 sps:$4 sm:$0xff]   ;;  %v5153_v31 = vld [vmem:[%s6622_s3 + $0x188] sm:$0xff]  }
 0x16f   : > { %1427 = vst [vmem:[#allocation2 + $0x164] sm:$0xf] %v1361_v12  ;;  %v1115_v28 = vrot.slane %v1114_v63, 4  ;;  %v5131_v36 = vld [vmem:[#allocation2 + $0x98] ss:$12 sps:$4 sm:$0xff]  }
 0x170   : > { %v5135_v8 = vld [vmem:[#allocation2 + $0xc8] ss:$12 sps:$4 sm:$0xff]   ;;  %v5157_v46 = vld [vmem:[%s6622_s3 + $0x1c0] sm:$0xff]   ;;  %v5141_v1 = vld [vmem:[#allocation2 + $0x110] ss:$12 sps:$4 sm:$0xff]  }
 0x171   : > { %v1120_v44 = vsel %vm5618_vm6, %v1115_v28, %v6079_v35  ;;  %v5145_v35 = vld [vmem:[%s6622_s3 + $0x218] sm:$0xff]   ;;  %v5136_v21 = vld [vmem:[#allocation2 + $0xe0] ss:$12 sps:$4 sm:$0xff]   ;;  %v5149_v39 = vld [vmem:[#allocation2 + $0x128] ss:$12 sps:$4 sm:$0xff]  }
 0x172   : > { %1197 = vst [vmem:[#allocation2 + $0x160] sm:$0xf] %v1120_v44  ;;  %2705 = vmatmul.mubr.bf16.vlgmr.msra.gmra.mxu0 %v5893_v26  ;;  %v5142_v26 = vld [vmem:[%s6622_s3 + $0x220] sm:$0xff]   ;;  %v6282_v54 = vld [vmem:[#allocation2 + $0x150] ss:$12 sps:$4 sm:$0xff]  }
 0x173   : > { %2712 = vmatprep.mubr.bf16.mxu0 %v5921_v19  ;;  %4941 = vmatpush3.bf16.msra.mxu0 %v5972_v42  ;;  %v6163_v19 = vld [vmem:[#allocation2 + $0xc0] ss:$12 sps:$4 sm:$0xff]   ;;  %v6166_v42 = vld [vmem:[#allocation2 + $0xdc] ss:$12 sps:$4 sm:$0xff]   ;;  %v5140_v14 = vld [vmem:[#allocation2 + $0xf8] ss:$12 sps:$4 sm:$0xff]  }
 0x174   : > { %1998 = vmatmul.mubr.bf16.gmra.mxu1 %v6148_v33  ;;  %4942 = vmatprep.subr.bf16.mxu0 %v5130_v52  ;;  %v5158_v45 = vld [vmem:[%s6622_s3 + $0x180] sm:$0xff]   ;;  %v5163_v28 = vld [vmem:[#allocation2 + $0x50] ss:$12 sps:$4 sm:$0xff]   ;;  %v5164_v44 = vld [vmem:[#allocation2 + $0x68] ss:$12 sps:$4 sm:$0xff]  }
 0x175   : > { %2005 = vmatprep.mubr.bf16.mxu1 %v6151_v50  ;;  %v5150_v41 = vld [vmem:[#allocation2 + $0x140] ss:$12 sps:$4 sm:$0xff]   ;;  %v5155_v63 = vld [vmem:[#allocation2 + $0x38] ss:$12 sps:$4 sm:$0xff]  }
 0x176   : > { %v5156_v10 = vld [vmem:[#allocation2 + $0x158] ss:$12 sps:$4 sm:$0xff]   ;;  %v5161_v12 = vld [vmem:[#allocation2 + $0x34] ss:$12 sps:$4 sm:$0xff]  }
 0x177   : > { %4943 = vmatpush3.bf16.msra.mxu0 %v5130_v52  ;;  %v5159_v52 = vld [vmem:[#allocation2 + $0x30] ss:$12 sps:$4 sm:$0xff]  }
 0x178   : > { %4944 = vmatprep.subr.bf16.mxu0 %v5139_v6 }
 0x179   : > { %v6278_v7 = vld [vmem:[#allocation2 + $0x154] ss:$12 sps:$4 sm:$0xff]  }
 0x17a   : > { %2713 = vmatmul.mubr.bf16.gmra.mxu0 %v5956_v9  ;;  %v5152_v9 = vld [vmem:[%s6622_s3 + $0x210] sm:$0xff]  }
 0x17b   : > { %2720 = vmatprep.mubr.bf16.mxu0 %v5998_v38  ;;  %4945 = vmatpush3.bf16.msra.mxu0 %v5139_v6  ;;  %v1131_v38 = vshrl.u32 %v6108_v62, 16  ;;  %v5120_v62 = vld [vmem:[#allocation2 + $0x38] ss:$12 sps:$4 sm:$0xff]  }
 0x17c   : > { %2006 = vmatmul.mubr.bf16.gmra.mxu1 %v6163_v19  ;;  %4946 = vmatprep.subr.bf16.mxu0 %v5142_v26  ;;  %v5165_v6 = vld [vmem:[#allocation2 + $0x4c] ss:$12 sps:$4 sm:$0xff]  }
 0x17d   : > { %2013 = vmatprep.mubr.bf16.mxu1 %v6166_v42  ;;  %v1133_v53 = vrot.slane %v1131_v38, 4  ;;  %v5170_v38 = vld [vmem:[#allocation2 + $0x64] ss:$12 sps:$4 sm:$0xff]  }
 0x17f   : > { %4947 = vmatpush3.bf16.msra.mxu0 %v5142_v26  ;;  %v5167_v26 = vld [vmem:[#allocation2 + $0x80] ss:$12 sps:$4 sm:$0xff]  }
 0x180   : > { %4948 = vmatprep.subr.bf16.mxu0 %v5145_v35 }
 0x182   : > { %2721 = vmatmul.mubr.bf16.gmra.mxu0 %v6060_v20  ;;  %v5162_v20 = vld [vmem:[%s6622_s3 + $0x200] sm:$0xff]  }
 0x183   : > { %2728 = vmatprep.mubr.bf16.mxu0 %v6065_v22  ;;  %4949 = vmatpush3.bf16.msra.mxu0 %v5145_v35  ;;  %v1134_v22 = vor.u32 %v1133_v53, %v6113_v58  ;;  %v5133_v58 = vld [vmem:[%s6622_s3 + $0x1e0] sm:$0xff]   ;;  %v5173_v53 = vld [vmem:[#allocation2 + $0xc8] ss:$12 sps:$4 sm:$0xff]  }
 0x184   : > { %2014 = vmatmul.mubr.bf16.gmra.mxu1 %v6178_v30  ;;  %4950 = vmatprep.subr.bf16.mxu0 %v5152_v9  ;;  %v5168_v35 = vld [vmem:[#allocation2 + $0x98] ss:$12 sps:$4 sm:$0xff]  }
 0x185   : > { %2021 = vmatprep.mubr.bf16.mxu1 %v6181_v43  ;;  %v1135_v29 = vrot.slane %v1134_v22, 4 }
 0x187   : > { %4951 = vmatpush3.bf16.msra.mxu0 %v5152_v9  ;;  %v5169_v9 = vld [vmem:[#allocation2 + $0x48] ss:$12 sps:$4 sm:$0xff]  }
 0x188   : > { %4952 = vmatprep.subr.bf16.mxu0 %v5154_v37 }
 0x18a   : > { %2729 = vmatmul.mubr.bf16.gmra.mxu0 %v6094_v15  ;;  %v6203_v15 = vld [vmem:[#allocation2 + $0x108] ss:$12 sps:$4 sm:$0xff]  }
 0x18b   : > { %2736 = vmatprep.mubr.bf16.mxu0 %v6096_v59  ;;  %4953 = vmatpush3.bf16.msra.mxu0 %v5154_v37  ;;  %v1202_v59 = vsel %vm1200_vm8, %v1135_v29, %v1201_v25  ;;  %v5172_v37 = vld [vmem:[#allocation2 + $0xb0] ss:$12 sps:$4 sm:$0xff]  }
 0x18c   : > { %2022 = vmatmul.mubr.bf16.gmra.mxu1 %v6193_v56  ;;  %4954 = vmatprep.subr.bf16.mxu0 %v5162_v20  ;;  %1203 = vst [vmem:[#allocation2 + $0x178] sm:$0xf] %v1202_v59  ;;  %v5175_v29 = vld [vmem:[#allocation2 + $0x7c] ss:$12 sps:$4 sm:$0xff]   ;;  %v5177_v59 = vld [vmem:[#allocation2 + $0xe0] ss:$12 sps:$4 sm:$0xff]  }
 0x18d   : > { %2029 = vmatprep.mubr.bf16.mxu1 %v6196_v18 }
 0x18f   : > { %4955 = vmatpush3.bf16.msra.mxu0 %v5162_v20  ;;  %v5174_v20 = vld [vmem:[#allocation2 + $0x60] ss:$12 sps:$4 sm:$0xff]  }
 0x192   : > { %2737 = vmatmul.mubr.bf16.gmra.mxu0 %v6120_v24  ;;  %v5132_v24 = vld [vmem:[#allocation2 + $0xb0] ss:$12 sps:$4 sm:$0xff]  }
 0x193   : > { %2744 = vmatprep.mubr.bf16.mxu0 %v6122_v16 }
 0x194   : > { %2030 = vmatmul.mubr.bf16.gmra.mxu1 %v6203_v15 }
 0x195   : > { %2037 = vmatprep.mubr.bf16.mxu1 %v6206_v40 }
 0x19a   : > { %2745 = vmatmul.mubr.bf16.gmra.mxu0 %v6128_v4 }
 0x19b   : > { %2752 = vmatprep.mubr.bf16.mxu0 %v6131_v51 }
 0x19c   : > { %2038 = vmatmul.mubr.bf16.gmra.mxu1 %v6211_v5 }
 0x19d   : > { %2045 = vmatprep.mubr.bf16.mxu1 %v6214_v34 }
 0x1a2   : > { %2753 = vmatmul.mubr.bf16.gmra.mxu0 %v6148_v33 }
 0x1a3   : > { %2760 = vmatprep.mubr.bf16.mxu0 %v6151_v50 }
 0x1a4   : > { %2046 = vmatmul.mubr.bf16.gmra.mxu1 %v6219_v49 }
 0x1a5   : > { %4912 = vmatprep.mubr.bf16.mxu1 %v5118_v27  ;;  %v5178_v27 = vld [vmem:[#allocation2 + $0xf8] ss:$12 sps:$4 sm:$0xff]  }
 0x1aa   : > { %2761 = vmatmul.mubr.bf16.gmra.mxu0 %v6163_v19 }
 0x1ab   : > { %2768 = vmatprep.mubr.bf16.mxu0 %v6166_v42 }
 0x1ac   : > { %4913 = vmatmul.mubr.bf16.vlgmr.msra.gmra.mxu1 %v5120_v62  ;;  %v5179_v62 = vld [vmem:[#allocation2 + $0x78] ss:$12 sps:$4 sm:$0xff]  }
 0x1ad   : > { %4691 = vmatpush3.bf16.msra.mxu1 %v5121_v57  ;;  %4916 = vmatprep.mubr.bf16.mxu1 %v5122_v17  ;;  %v6288_v17 = vld [vmem:[%s6623_s4] ss:$0 sm:$0xff] }
 0x1ae   : > { %4692 = vmatprep.subr.bf16.mxu1 %v5124_v2 }
 0x1b1   : > { %4693 = vmatpush3.bf16.msra.mxu1 %v5125_v61 }
 0x1b2   : > { %2769 = vmatmul.mubr.bf16.gmra.mxu0 %v6178_v30  ;;  %4694 = vmatprep.subr.bf16.mxu1 %v5128_v23 }
 0x1b3   : > { %2776 = vmatprep.mubr.bf16.mxu0 %v6181_v43 }
 0x1b4   : > { %4917 = vmatmul.mubr.bf16.gmra.mxu1 %v5126_v3 }
 0x1b5   : > { %4920 = vmatprep.mubr.bf16.mxu1 %v5127_v13  ;;  %4695 = vmatpush3.bf16.msra.mxu1 %v5129_v47  ;;  %v5180_v13 = vld [vmem:[#allocation2 + $0x110] ss:$12 sps:$4 sm:$0xff]  }
 0x1b6   : > { %4696 = vmatprep.subr.bf16.mxu1 %v5133_v58 }
 0x1b9   : > { %4697 = vmatpush3.bf16.msra.mxu1 %v5134_v0 }
 0x1ba   : > { %2777 = vmatmul.mubr.bf16.gmra.mxu0 %v6193_v56  ;;  %4698 = vmatprep.subr.bf16.mxu1 %v5137_v48 }
 0x1bb   : > { %2784 = vmatprep.mubr.bf16.mxu0 %v6196_v18 }
 0x1bc   : > { %4921 = vmatmul.mubr.bf16.gmra.mxu1 %v5131_v36 }
 0x1bd   : > { %4924 = vmatprep.mubr.bf16.mxu1 %v5132_v24  ;;  %4699 = vmatpush3.bf16.msra.mxu1 %v5138_v11  ;;  %v5181_v11 = vld [vmem:[#allocation2 + $0x128] ss:$12 sps:$4 sm:$0xff]  }
 0x1be   : > { %4700 = vmatprep.subr.bf16.mxu1 %v5143_v32 }
 0x1c1   : > { %4701 = vmatpush3.bf16.msra.mxu1 %v5144_v55 }
 0x1c2   : > { %2785 = vmatmul.mubr.bf16.gmra.mxu0 %v6203_v15  ;;  %4702 = vmatprep.subr.bf16.mxu1 %v5151_v60 }
 0x1c3   : > { %2792 = vmatprep.mubr.bf16.mxu0 %v6206_v40 }
 0x1c4   : > { %4925 = vmatmul.mubr.bf16.gmra.mxu1 %v5135_v8 }
 0x1c5   : > { %4928 = vmatprep.mubr.bf16.mxu1 %v5136_v21  ;;  %4703 = vmatpush3.bf16.msra.mxu1 %v5153_v31 }
 0x1c6   : > { %4704 = vmatprep.subr.bf16.mxu1 %v5157_v46 }
 0x1c9   : > { %4705 = vmatpush3.bf16.msra.mxu1 %v5158_v45 }
 0x1ca   : > { %2793 = vmatmul.mubr.bf16.gmra.mxu0 %v6211_v5 }
 0x1cb   : > { %2800 = vmatprep.mubr.bf16.mxu0 %v6214_v34 }
 0x1cc   : > { %4929 = vmatmul.mubr.bf16.gmra.mxu1 %v5140_v14  ;;  %v5182_v14 = vld [vmem:[#allocation2 + $0x140] ss:$12 sps:$4 sm:$0xff]  }
 0x1cd   : > { %4932 = vmatprep.mubr.bf16.mxu1 %v5141_v1 }
 0x1d2   : > { %2801 = vmatmul.mubr.bf16.gmra.mxu0 %v6219_v49 }
 0x1d3   : > { %2808 = vmatprep.mubr.bf16.mxu0 %v6278_v7 }
 0x1d4   : > { %4933 = vmatmul.mubr.bf16.gmra.mxu1 %v5149_v39  ;;  %v5183_v39 = vld [vmem:[#allocation2 + $0x158] ss:$12 sps:$4 sm:$0xff]  }
 0x1d5   : > { %4936 = vmatprep.mubr.bf16.mxu1 %v5150_v41 }
 0x1da   : > { %2809 = vmatmul.mubr.bf16.gmra.mxu0 %v6282_v54 }
 0x1db   : > { %4956 = vmatprep.mubr.bf16.mxu0 %v5155_v63 }
 0x1dc   : > { %4937 = vmatmul.mubr.bf16.gmra.mxu1 %v5156_v10 }
 0x1dd   : > { %3495 = vmatprep.mubr.bf16.mxu1 %v5161_v12  ;;  %v4870_v22 = vpop.f32.mrf.mxu0 }
 0x1df   : > { %v2088_v25 = vpop.f32.mrf.mxu0 }
 0x1e1   : > { %v4871_v2 = vpop.f32.mrf.mxu0 }
 0x1e2   : > { %4957 = vmatmul.mubr.bf16.vlgmr.msra.gmra.mxu0 %v5163_v28 }
 0x1e3   : > { %4960 = vmatprep.mubr.bf16.mxu0 %v5164_v44  ;;  %v2091_v47 = vpop.f32.mrf.mxu0 }
 0x1e4   : > { %3496 = vmatmul.mubr.bf16.vlgmr.msra.gmra.mxu1 %v5159_v52 }
 0x1e5   : > { %3503 = vmatprep.mubr.bf16.mxu1 %v5165_v6 }
 0x1ea   : > { %4961 = vmatmul.mubr.bf16.gmra.mxu0 %v5167_v26 }
 0x1eb   : > { %4964 = vmatprep.mubr.bf16.mxu0 %v5168_v35 }
 0x1ec   : > { %3504 = vmatmul.mubr.bf16.gmra.mxu1 %v5169_v9 }
 0x1ed   : > { %3511 = vmatprep.mubr.bf16.mxu1 %v5170_v38  ;;  %v5184_v38 = vld [vmem:[#allocation2 + $0x170] ss:$12 sps:$4 sm:$0xff]  }
 0x1f2   : > { %4965 = vmatmul.mubr.bf16.gmra.mxu0 %v5172_v37  ;;  %v4462_v57 = vpop.f32.mrf.mxu1 }
 0x1f3   : > { %4968 = vmatprep.mubr.bf16.mxu0 %v5173_v53 }
 0x1f4   : > { %3512 = vmatmul.mubr.bf16.gmra.mxu1 %v5174_v20  ;;  %v4463_v61 = vpop.f32.mrf.mxu1 }
 0x1f5   : > { %3519 = vmatprep.mubr.bf16.mxu1 %v5175_v29  ;;  %v4464_v23 = vadd.f32 %v4463_v61, %v4462_v57 }
 0x1f6   : > { %v4465_v3 = vpop.f32.mrf.mxu1 }
 0x1f7   : > { %v1944_v58 = vadd.f32 %v4464_v23, %v6288_v17 }
 0x1f8   : > { %v4466_v0 = vpop.f32.mrf.mxu1 }
 0x1f9   : > { %v4467_v48 = vadd.f32 %v4466_v0, %v4465_v3  ;;  %v6292_v36 = vadd.f32 %v2088_v25, %v1944_v58 }
 0x1fa   : > { %4969 = vmatmul.mubr.bf16.gmra.mxu0 %v5177_v59 }
 0x1fb   : > { %4972 = vmatprep.mubr.bf16.mxu0 %v5178_v27  ;;  %v1947_v24 = vadd.f32 %v4467_v48, %v6288_v17 }
 0x1fc   : > { %3520 = vmatmul.mubr.bf16.gmra.mxu1 %v5179_v62  ;;  %v4874_v32 = vpop.f32.mrf.mxu0 }
 0x1fd   : > { %3527 = vmatprep.mubr.bf16.mxu1 %v6122_v16  ;;  %v6297_v16 = vadd.f32 %v2091_v47, %v1947_v24 }
 0x1fe   : > { %v2104_v55 = vpop.f32.mrf.mxu0 }
 0x200   : > { %v4468_v60 = vpop.f32.mrf.mxu1  ;;  %v4875_v31 = vpop.f32.mrf.mxu0 }
 0x202   : > { %4973 = vmatmul.mubr.bf16.gmra.mxu0 %v5180_v13  ;;  %v4469_v8 = vpop.f32.mrf.mxu1  ;;  %v2107_v21 = vpop.f32.mrf.mxu0 }
 0x203   : > { %4976 = vmatprep.mubr.bf16.mxu0 %v5181_v11  ;;  %v4470_v46 = vadd.f32 %v4469_v8, %v4468_v60 }
 0x204   : > { %3528 = vmatmul.mubr.bf16.gmra.mxu1 %v6128_v4  ;;  %v4471_v45 = vpop.f32.mrf.mxu1 }
 0x205   : > { %3535 = vmatprep.mubr.bf16.mxu1 %v6131_v51  ;;  %v1952_v1 = vadd.f32 %v4470_v46, %v6288_v17  ;;  %v6300_v41 = vpop.f32.mrf.mxu0 }
 0x206   : > { %v4472_v63 = vpop.f32.mrf.mxu1 }
 0x207   : > { %v4473_v10 = vadd.f32 %v4472_v63, %v4471_v45  ;;  %v6302_v4 = vadd.f32 %v4870_v22, %v1952_v1  ;;  %v2120_v51 = vpop.f32.mrf.mxu0 }
 0x208   : > { %v4474_v12 = vpop.f32.mrf.mxu1 }
 0x209   : > { %v1955_v28 = vadd.f32 %v4473_v10, %v6288_v17  ;;  %v6307_v44 = vpop.f32.mrf.mxu0 }
 0x20a   : > { %4977 = vmatmul.mubr.bf16.gmra.mxu0 %v5182_v14  ;;  %v4475_v52 = vpop.f32.mrf.mxu1 }
 0x20b   : > { %4980 = vmatprep.mubr.bf16.mxu0 %v5183_v39  ;;  %v4476_v6 = vadd.f32 %v4475_v52, %v4474_v12  ;;  %v6309_v26 = vadd.f32 %v4871_v2, %v1955_v28  ;;  %v2123_v35 = vpop.f32.mrf.mxu0 }
 0x20c   : > { %3536 = vmatmul.mubr.bf16.gmra.mxu1 %v6148_v33  ;;  %v4477_v9 = vpop.f32.mrf.mxu1 }
 0x20d   : > { %3543 = vmatprep.mubr.bf16.mxu1 %v6151_v50  ;;  %v1960_v37 = vadd.f32 %v4476_v6, %v6288_v17 }
 0x20e   : > { %v4478_v20 = vpop.f32.mrf.mxu1 }
 0x20f   : > { %v4479_v33 = vadd.f32 %v4478_v20, %v4477_v9  ;;  %v6314_v22 = vadd.f32 %v2104_v55, %v1960_v37 }
 0x211   : > { %v1963_v25 = vadd.f32 %v4479_v33, %v6288_v17 }
 0x212   : > { %v6312_v53 = vpop.f32.mrf.mxu0  ;;  %4981 = vmatmul.mubr.bf16.gmra.mxu0 %v5184_v38 }
 0x213   : > { %v6323_v62 = vadd.f32 %v2107_v21, %v1963_v25 }
 0x214   : > { %v6316_v29 = vpop.f32.mrf.mxu0  ;;  %v4480_v50 = vpop.f32.mrf.mxu1  ;;  %3544 = vmatmul.mubr.bf16.gmra.mxu1 %v6163_v19 }
 0x215   : > { %3551 = vmatprep.mubr.bf16.mxu1 %v6166_v42 }
 0x216   : > { %v6321_v59 = vpop.f32.mrf.mxu0  ;;  %v4481_v27 = vpop.f32.mrf.mxu1 }
 0x217   : > { %v4482_v57 = vadd.f32 %v4481_v27, %v4480_v50 }
 0x218   : > { %v6325_v2 = vpop.f32.mrf.mxu0  ;;  %v4483_v61 = vpop.f32.mrf.mxu1 }
 0x219   : > { %v1968_v23 = vadd.f32 %v4482_v57, %v6288_v17 }
 0x21a   : > { %v6328_v47 = vpop.f32.mrf.mxu0  ;;  %v4484_v3 = vpop.f32.mrf.mxu1 }
 0x21b   : > { %v4485_v58 = vadd.f32 %v4484_v3, %v4483_v61  ;;  %v6330_v19 = vadd.f32 %v4874_v32, %v1968_v23 }
 0x21c   : > { %v6332_v13 = vpop.f32.mrf.mxu0  ;;  %v4486_v42 = vpop.f32.mrf.mxu1  ;;  %3552 = vmatmul.mubr.bf16.gmra.mxu1 %v6178_v30 }
 0x21d   : > { %v1971_v0 = vadd.f32 %v4485_v58, %v6288_v17  ;;  %3559 = vmatprep.mubr.bf16.mxu1 %v6181_v43 }
 0x21e   : > { %v6337_v48 = vpop.f32.mrf.mxu0  ;;  %v4487_v11 = vpop.f32.mrf.mxu1 }
 0x21f   : > { %v4488_v24 = vadd.f32 %v4487_v11, %v4486_v42  ;;  %v6339_v55 = vadd.f32 %v4875_v31, %v1971_v0 }
 0x220   : > { %v6341_v60 = vpop.f32.mrf.mxu0  ;;  %v4489_v8 = vpop.f32.mrf.mxu1 }
 0x221   : > { %v1976_v32 = vadd.f32 %v4488_v24, %v6288_v17 }
 0x222   : > { %v6344_v46 = vpop.f32.mrf.mxu0  ;;  %v4490_v21 = vpop.f32.mrf.mxu1 }
 0x223   : > { %v4491_v45 = vadd.f32 %v4490_v21, %v4489_v8  ;;  %v6346_v30 = vadd.f32 %v2120_v51, %v1976_v32 }
 0x224   : > { %v6348_v14 = vpop.f32.mrf.mxu0  ;;  %v4492_v43 = vpop.f32.mrf.mxu1  ;;  %3560 = vmatmul.mubr.bf16.gmra.mxu1 %v6193_v56 }
 0x225   : > { %v1979_v1 = vadd.f32 %v4491_v45, %v6288_v17  ;;  %3567 = vmatprep.mubr.bf16.mxu1 %v6196_v18 }
 0x226   : > { %v6353_v31 = vpop.f32.mrf.mxu0  ;;  %v4493_v39 = vpop.f32.mrf.mxu1 }
 0x227   : > { %v4494_v63 = vadd.f32 %v4493_v39, %v4492_v43  ;;  %v6355_v10 = vadd.f32 %v2123_v35, %v1979_v1 }
 0x228   : > { %v6357_v12 = vpop.f32.mrf.mxu0  ;;  %v4495_v28 = vpop.f32.mrf.mxu1 }
 0x229   : > { %v1984_v51 = vadd.f32 %v4494_v63, %v6288_v17 }
 0x22a   : > { %v6360_v52 = vpop.f32.mrf.mxu0  ;;  %v4496_v6 = vpop.f32.mrf.mxu1 }
 0x22b   : > { %v4497_v9 = vadd.f32 %v4496_v6, %v4495_v28  ;;  %v6363_v56 = vadd.f32 %v6300_v41, %v1984_v51 }
 0x22c   : > { %v6365_v38 = vpop.f32.mrf.mxu0  ;;  %v4498_v18 = vpop.f32.mrf.mxu1  ;;  %3568 = vmatmul.mubr.bf16.gmra.mxu1 %v6203_v15 }
 0x22d   : > { %v1987_v35 = vadd.f32 %v4497_v9, %v6288_v17  ;;  %3575 = vmatprep.mubr.bf16.mxu1 %v6206_v40 }
 0x22e   : > { %v6370_v37 = vpop.f32.mrf.mxu0  ;;  %v4499_v20 = vpop.f32.mrf.mxu1 }
 0x22f   : > { %v4500_v33 = vadd.f32 %v4499_v20, %v4498_v18  ;;  %v6373_v50 = vadd.f32 %v6307_v44, %v1987_v35 }
 0x230   : > { %v6375_v25 = vpop.f32.mrf.mxu0  ;;  %v4501_v41 = vpop.f32.mrf.mxu1 }
 0x231   : > { %v1992_v27 = vadd.f32 %v4500_v33, %v6288_v17 }
 0x232   : > { %v4584_v57 = vpop.f32.mrf.mxu0  ;;  %v4502_v61 = vpop.f32.mrf.mxu1 }
 0x233   : > { %v4503_v23 = vadd.f32 %v4502_v61, %v4501_v41  ;;  %v6379_v15 = vadd.f32 %v6316_v29, %v1992_v27  ;;  %v5187_v27 = vld [vmem:[#allocation2 + $0x16c] ss:$12 sps:$4 sm:$0xff]  }
 0x234   : > { %v4585_v3 = vpop.f32.mrf.mxu0  ;;  %v4504_v40 = vpop.f32.mrf.mxu1  ;;  %3576 = vmatmul.mubr.bf16.gmra.mxu1 %v6211_v5 }
 0x235   : > { %v1995_v58 = vadd.f32 %v4503_v23, %v6288_v17  ;;  %v6383_v42 = vadd.f32 %v4585_v3, %v4584_v57  ;;  %3583 = vmatprep.mubr.bf16.mxu1 %v6214_v34 }
 0x236   : > { %v4587_v44 = vpop.f32.mrf.mxu0  ;;  %v4505_v0 = vpop.f32.mrf.mxu1 }
 0x237   : > { %v4506_v11 = vadd.f32 %v4505_v0, %v4504_v40  ;;  %v6387_v24 = vadd.f32 %v6325_v2, %v1995_v58 }
 0x238   : > { %v4588_v8 = vpop.f32.mrf.mxu0  ;;  %v4507_v32 = vpop.f32.mrf.mxu1 }
 0x239   : > { %v2000_v29 = vadd.f32 %v4506_v11, %v6288_v17  ;;  %v6390_v21 = vadd.f32 %v4588_v8, %v4587_v44 }
 0x23a   : > { %v4590_v45 = vpop.f32.mrf.mxu0  ;;  %v4508_v5 = vpop.f32.mrf.mxu1 }
 0x23b   : > { %v4509_v43 = vadd.f32 %v4508_v5, %v4507_v32  ;;  %v6393_v1 = vadd.f32 %v6312_v53, %v2000_v29  ;;  %v5185_v32 = vld [vmem:[#allocation2 + $0x168] ss:$12 sps:$4 sm:$0xff]  }
 0x23c   : > { %v4591_v39 = vpop.f32.mrf.mxu0  ;;  %v4510_v34 = vpop.f32.mrf.mxu1  ;;  %3584 = vmatmul.mubr.bf16.gmra.mxu1 %v6219_v49 }
 0x23d   : > { %v2003_v63 = vadd.f32 %v4509_v43, %v6288_v17  ;;  %v6397_v2 = vadd.f32 %v4591_v39, %v4590_v45  ;;  %3591 = vmatprep.mubr.bf16.mxu1 %v6278_v7 }
 0x23e   : > { %v4593_v28 = vpop.f32.mrf.mxu0  ;;  %v4511_v51 = vpop.f32.mrf.mxu1 }
 0x23f   : > { %v4512_v6 = vadd.f32 %v4511_v51, %v4510_v34  ;;  %v6401_v9 = vadd.f32 %v6321_v59, %v2003_v63 }
 0x240   : > { %v4594_v18 = vpop.f32.mrf.mxu0  ;;  %v4513_v35 = vpop.f32.mrf.mxu1 }
 0x241   : > { %v2008_v53 = vadd.f32 %v4512_v6, %v6288_v17  ;;  %v6404_v20 = vadd.f32 %v4594_v18, %v4593_v28 }
 0x242   : > { %v4596_v33 = vpop.f32.mrf.mxu0  ;;  %v4514_v49 = vpop.f32.mrf.mxu1 }
 0x243   : > { %v4515_v41 = vadd.f32 %v4514_v49, %v4513_v35  ;;  %v6407_v57 = vadd.f32 %v6332_v13, %v2008_v53 }
 0x244   : > { %v4597_v7 = vpop.f32.mrf.mxu0  ;;  %v4516_v61 = vpop.f32.mrf.mxu1  ;;  %3592 = vmatmul.mubr.bf16.gmra.mxu1 %v6282_v54 }
 0x245   : > { %v2011_v59 = vadd.f32 %v4515_v41, %v6288_v17  ;;  %v6411_v23 = vadd.f32 %v4597_v7, %v4596_v33  ;;  %3599 = vmatprep.mubr.bf16.mxu1 %v5187_v27 }
 0x246   : > { %v4599_v3 = vpop.f32.mrf.mxu0  ;;  %v4517_v40 = vpop.f32.mrf.mxu1 }
 0x247   : > { %v4518_v58 = vadd.f32 %v4517_v40, %v4516_v61  ;;  %v6414_v44 = vadd.f32 %v6341_v60, %v2011_v59 }
 0x248   : > { %v4600_v0 = vpop.f32.mrf.mxu0  ;;  %v4519_v11 = vpop.f32.mrf.mxu1 }
 0x249   : > { %v2016_v13 = vadd.f32 %v4518_v58, %v6288_v17  ;;  %v6417_v8 = vadd.f32 %v4600_v0, %v4599_v3 }
 0x24a   : > { %v4602_v29 = vpop.f32.mrf.mxu0  ;;  %v4520_v54 = vpop.f32.mrf.mxu1 }
 0x24b   : > { %v4521_v45 = vadd.f32 %v4520_v54, %v4519_v11  ;;  %v6420_v5 = vadd.f32 %v6328_v47, %v2016_v13 }
 0x24c   : > { %v4603_v43 = vpop.f32.mrf.mxu0  ;;  %v4522_v39 = vpop.f32.mrf.mxu1  ;;  %3600 = vmatmul.mubr.bf16.gmra.mxu1 %v5185_v32 }
 0x24d   : > { %v2019_v34 = vadd.f32 %v4521_v45, %v6288_v17  ;;  %v6423_v60 = vadd.f32 %v4603_v43, %v4602_v29 }
 0x24e   : > { %v4605_v63 = vpop.f32.mrf.mxu0  ;;  %v4523_v28 = vpop.f32.mrf.mxu1 }
 0x24f   : > { %v4524_v51 = vadd.f32 %v4523_v28, %v4522_v39  ;;  %v6426_v6 = vadd.f32 %v6337_v48, %v2019_v34 }
 0x250   : > { %v4606_v18 = vpop.f32.mrf.mxu0  ;;  %v4525_v35 = vpop.f32.mrf.mxu1 }
 0x251   : > { %v2024_v53 = vadd.f32 %v4524_v51, %v6288_v17  ;;  %v6429_v33 = vadd.f32 %v4606_v18, %v4605_v63 }
 0x252   : > { %v4608_v47 = vpop.f32.mrf.mxu0  ;;  %v4526_v49 = vpop.f32.mrf.mxu1 }
 0x253   : > { %v4527_v41 = vadd.f32 %v4526_v49, %v4525_v35  ;;  %v6432_v27 = vadd.f32 %v6348_v14, %v2024_v53 }
 0x254   : > { %v4609_v7 = vpop.f32.mrf.mxu0  ;;  %v4528_v61 = vpop.f32.mrf.mxu1 }
 0x255   : > { %v2027_v59 = vadd.f32 %v4527_v41, %v6288_v17  ;;  %v6435_v3 = vadd.f32 %v4609_v7, %v4608_v47 }
 0x256   : > { %v4611_v48 = vpop.f32.mrf.mxu0  ;;  %v4529_v40 = vpop.f32.mrf.mxu1 }
 0x257   : > { %v4530_v58 = vadd.f32 %v4529_v40, %v4528_v61  ;;  %v6438_v0 = vadd.f32 %v6357_v12, %v2027_v59 }
 0x258   : > { %v4612_v11 = vpop.f32.mrf.mxu0  ;;  %v4531_v13 = vpop.f32.mrf.mxu1 }
 0x259   : > { %v2032_v32 = vadd.f32 %v4530_v58, %v6288_v17  ;;  %v6441_v29 = vadd.f32 %v4612_v11, %v4611_v48 }
 0x25a   : > { %v4614_v14 = vpop.f32.mrf.mxu0  ;;  %v4532_v54 = vpop.f32.mrf.mxu1 }
 0x25b   : > { %v4533_v45 = vadd.f32 %v4532_v54, %v4531_v13  ;;  %v6444_v43 = vadd.f32 %v6344_v46, %v2032_v32 }
 0x25c   : > { %v4615_v39 = vpop.f32.mrf.mxu0  ;;  %v4534_v34 = vpop.f32.mrf.mxu1 }
 0x25d   : > { %v2035_v63 = vadd.f32 %v4533_v45, %v6288_v17  ;;  %v6447_v28 = vadd.f32 %v4615_v39, %v4614_v14 }
 0x25e   : > { %v4617_v12 = vpop.f32.mrf.mxu0  ;;  %v4535_v51 = vpop.f32.mrf.mxu1 }
 0x25f   : > { %v4536_v18 = vadd.f32 %v4535_v51, %v4534_v34  ;;  %v6450_v35 = vadd.f32 %v6353_v31, %v2035_v63 }
 0x260   : > { %v4618_v53 = vpop.f32.mrf.mxu0  ;;  %v4537_v47 = vpop.f32.mrf.mxu1 }
 0x261   : > { %v2040_v49 = vadd.f32 %v4536_v18, %v6288_v17  ;;  %v6453_v41 = vadd.f32 %v4618_v53, %v4617_v12 }
 0x262   : > { %v4620_v46 = vpop.f32.mrf.mxu0  ;;  %v4538_v7 = vpop.f32.mrf.mxu1 }
 0x263   : > { %v4539_v61 = vadd.f32 %v4538_v7, %v4537_v47  ;;  %v6456_v59 = vadd.f32 %v6365_v38, %v2040_v49 }
 0x264   : > { %v4621_v48 = vpop.f32.mrf.mxu0  ;;  %v4540_v40 = vpop.f32.mrf.mxu1 }
 0x265   : > { %v2043_v58 = vadd.f32 %v4539_v61, %v6288_v17  ;;  %v6459_v11 = vadd.f32 %v4621_v48, %v4620_v46 }
 0x266   : > { %v4623_v31 = vpop.f32.mrf.mxu0  ;;  %v4541_v13 = vpop.f32.mrf.mxu1 }
 0x267   : > { %v4542_v32 = vadd.f32 %v4541_v13, %v4540_v40  ;;  %v6462_v14 = vadd.f32 %v6375_v25, %v2043_v58 }
 0x268   : > { %v4624_v54 = vpop.f32.mrf.mxu0  ;;  %v4543_v45 = vpop.f32.mrf.mxu1 }
 0x269   : > { %v2048_v39 = vadd.f32 %v4542_v32, %v6288_v17  ;;  %v6465_v34 = vadd.f32 %v4624_v54, %v4623_v31 }
 0x26a   : > { %v4626_v38 = vpop.f32.mrf.mxu0  ;;  %v4544_v63 = vpop.f32.mrf.mxu1 }
 0x26b   : > { %v4545_v12 = vadd.f32 %v4544_v63, %v4543_v45  ;;  %v6468_v51 = vadd.f32 %v6360_v52, %v2048_v39 }
 0x26c   : > { %v4627_v18 = vpop.f32.mrf.mxu0  ;;  %v4914_v53 = vpop.f32.mrf.mxu1 }
 0x26d   : > { %v2051_v47 = vadd.f32 %v4545_v12, %v6288_v17  ;;  %v4628_v49 = vadd.f32 %v4627_v18, %v4626_v38  ;;  %v2860_v25 = vadd.f32 %v4914_v53, %v6397_v2 }
 0x26e   : > { %v4629_v46 = vpop.f32.mrf.mxu0  ;;  %v2851_v7 = vpop.f32.mrf.mxu1 }
 0x26f   : > { %v6473_v61 = vadd.f32 %v2860_v25, %v6302_v4  ;;  %v2852_v48 = vadd.f32 %v6383_v42, %v2851_v7  ;;  %v6477_v40 = vadd.f32 %v6370_v37, %v2051_v47 }
 0x270   : > { %v4630_v58 = vpop.f32.mrf.mxu0  ;;  %v4915_v52 = vpop.f32.mrf.mxu1 }
 0x271   : > { %v6480_v31 = vadd.f32 %v2852_v48, %v6292_v36  ;;  %v4631_v13 = vadd.f32 %v4630_v58, %v4629_v46  ;;  %v2863_v17 = vadd.f32 %v4915_v52, %v6404_v20 }
 0x272   : > { %v4632_v32 = vpop.f32.mrf.mxu0  ;;  %v2854_v2 = vpop.f32.mrf.mxu1 }
 0x273   : > { %v6484_v54 = vadd.f32 %v2863_v17, %v6309_v26  ;;  %v2855_v4 = vadd.f32 %v6390_v21, %v2854_v2 }
 0x274   : > { %v4633_v45 = vpop.f32.mrf.mxu0  ;;  %v4918_v42 = vpop.f32.mrf.mxu1 }
 0x275   : > { %v6488_v37 = vadd.f32 %v2855_v4, %v6297_v16  ;;  %v4634_v39 = vadd.f32 %v4633_v45, %v4632_v32  ;;  %v2876_v38 = vadd.f32 %v4918_v42, %v6423_v60 }
 0x276   : > { %v4635_v36 = vpop.f32.mrf.mxu0  ;;  %v2867_v63 = vpop.f32.mrf.mxu1 }
 0x277   : > { %v6492_v12 = vadd.f32 %v2876_v38, %v6330_v19  ;;  %v2868_v20 = vadd.f32 %v6411_v23, %v2867_v63 }
 0x278   : > { %v4636_v18 = vpop.f32.mrf.mxu0  ;;  %v4919_v26 = vpop.f32.mrf.mxu1 }
 0x279   : > { %v6496_v53 = vadd.f32 %v2868_v20, %v6314_v22  ;;  %v4637_v21 = vadd.f32 %v4636_v18, %v4635_v36  ;;  %v2879_v47 = vadd.f32 %v4919_v26, %v6429_v33 }
 0x27a   : > { %v4638_v16 = vpop.f32.mrf.mxu0  ;;  %v2870_v25 = vpop.f32.mrf.mxu1 }
 0x27b   : > { %v6500_v46 = vadd.f32 %v2879_v47, %v6339_v55  ;;  %v2871_v60 = vadd.f32 %v6417_v8, %v2870_v25 }
 0x27c   : > { %v4639_v7 = vpop.f32.mrf.mxu0  ;;  %v4922_v19 = vpop.f32.mrf.mxu1 }
 0x27d   : > { %v6504_v48 = vadd.f32 %v2871_v60, %v6323_v62  ;;  %v4640_v23 = vadd.f32 %v4639_v7, %v4638_v16  ;;  %v2892_v58 = vadd.f32 %v4922_v19, %v6447_v28 }
 0x27e   : > { %v4641_v22 = vpop.f32.mrf.mxu0  ;;  %v2883_v52 = vpop.f32.mrf.mxu1 }
 0x27f   : > { %v6508_v17 = vadd.f32 %v2892_v58, %v6363_v56  ;;  %v2884_v33 = vadd.f32 %v6435_v3, %v2883_v52 }
 0x280   : > { %v4642_v32 = vpop.f32.mrf.mxu0  ;;  %v4923_v55 = vpop.f32.mrf.mxu1 }
 0x281   : > { %v6512_v2 = vadd.f32 %v2884_v33, %v6346_v30  ;;  %v4643_v8 = vadd.f32 %v4642_v32, %v4641_v22  ;;  %v2895_v4 = vadd.f32 %v4923_v55, %v6453_v41 }
 0x282   : > { %v4644_v62 = vpop.f32.mrf.mxu0  ;;  %v2886_v45 = vpop.f32.mrf.mxu1 }
 0x283   : > { %v6516_v42 = vadd.f32 %v2895_v4, %v6373_v50  ;;  %v2887_v28 = vadd.f32 %v6441_v29, %v2886_v45 }
 0x284   : > { %v4645_v38 = vpop.f32.mrf.mxu0  ;;  %v4926_v56 = vpop.f32.mrf.mxu1 }
 0x285   : > { %v6520_v36 = vadd.f32 %v2887_v28, %v6355_v10  ;;  %v4646_v3 = vadd.f32 %v4645_v38, %v4644_v62  ;;  %v2908_v63 = vadd.f32 %v4926_v56, %v4628_v49 }
 0x286   : > { %v4647_v20 = vpop.f32.mrf.mxu0  ;;  %v2899_v30 = vpop.f32.mrf.mxu1 }
 0x287   : > { %v6523_v18 = vadd.f32 %v2908_v63, %v6393_v1  ;;  %v2900_v41 = vadd.f32 %v6459_v11, %v2899_v30 }
 0x288   : > { %v4648_v26 = vpop.f32.mrf.mxu0  ;;  %v4927_v47 = vpop.f32.mrf.mxu1 }
 0x289   : > { %v6527_v50 = vadd.f32 %v2900_v41, %v6379_v15  ;;  %v4649_v29 = vadd.f32 %v4648_v26, %v4647_v20  ;;  %v2911_v16 = vadd.f32 %v4927_v47, %v4631_v13 }
 0x28a   : > { %v4650_v25 = vpop.f32.mrf.mxu0  ;;  %v2902_v60 = vpop.f32.mrf.mxu1 }
 0x28b   : > { %v6530_v10 = vadd.f32 %v2911_v16, %v6401_v9  ;;  %v2903_v49 = vadd.f32 %v6465_v34, %v2902_v60 }
 0x28c   : > { %v4651_v7 = vpop.f32.mrf.mxu0  ;;  %v4930_v19 = vpop.f32.mrf.mxu1 }
 0x28d   : > { %v6534_v1 = vadd.f32 %v2903_v49, %v6387_v24  ;;  %v4652_v11 = vadd.f32 %v4651_v7, %v4650_v25  ;;  %v2924_v58 = vadd.f32 %v4930_v19, %v4640_v23 }
 0x28e   : > { %v4653_v22 = vpop.f32.mrf.mxu0  ;;  %v2915_v52 = vpop.f32.mrf.mxu1 }
 0x28f   : > { %v6537_v15 = vadd.f32 %v2924_v58, %v6420_v5  ;;  %v2916_v13 = vadd.f32 %v4634_v39, %v2915_v52 }
 0x290   : > { %v4654_v33 = vpop.f32.mrf.mxu0  ;;  %v4931_v32 = vpop.f32.mrf.mxu1 }
 0x291   : > { %v6540_v9 = vadd.f32 %v2916_v13, %v6407_v57  ;;  %v4655_v55 = vadd.f32 %v4654_v33, %v4653_v22  ;;  %v2927_v34 = vadd.f32 %v4931_v32, %v4643_v8 }
 0x292   : > { %v4656_v4 = vpop.f32.mrf.mxu0  ;;  %v2918_v62 = vpop.f32.mrf.mxu1 }
 0x293   : > { %v6543_v24 = vadd.f32 %v2927_v34, %v6426_v6  ;;  %v2919_v45 = vadd.f32 %v4637_v21, %v2918_v62 }
 0x294   : > { %v4657_v23 = vpop.f32.mrf.mxu0  ;;  %v4934_v28 = vpop.f32.mrf.mxu1 }
 0x295   : > { %v6546_v38 = vadd.f32 %v2919_v45, %v6414_v44  ;;  %v4658_v5 = vadd.f32 %v4657_v23, %v4656_v4  ;;  %v2940_v39 = vadd.f32 %v4934_v28, %v4652_v11 }
 0x296   : > { %v4659_v56 = vpop.f32.mrf.mxu0  ;;  %v2931_v63 = vpop.f32.mrf.mxu1 }
 0x297   : > { %v6549_v57 = vadd.f32 %v2940_v39, %v6444_v43  ;;  %v2932_v20 = vadd.f32 %v4646_v3, %v2931_v63 }
 0x298   : > { %v4660_v8 = vpop.f32.mrf.mxu0  ;;  %v4935_v30 = vpop.f32.mrf.mxu1 }
 0x299   : > { %v6552_v41 = vadd.f32 %v2932_v20, %v6432_v27  ;;  %v4661_v6 = vadd.f32 %v4660_v8, %v4659_v56  ;;  %v2943_v21 = vadd.f32 %v4935_v30, %v4655_v55 }
 0x29a   : > { %v4662_v26 = vpop.f32.mrf.mxu0  ;;  %v2934_v47 = vpop.f32.mrf.mxu1 }
 0x29b   : > { %v6555_v44 = vadd.f32 %v2943_v21, %v6450_v35  ;;  %v2935_v16 = vadd.f32 %v4649_v29, %v2934_v47 }
 0x29c   : > { %v4663_v25 = vpop.f32.mrf.mxu0  ;;  %v4938_v60 = vpop.f32.mrf.mxu1 }
 0x29d   : > { %v6558_v49 = vadd.f32 %v2935_v16, %v6438_v0  ;;  %v4664_v43 = vadd.f32 %v4663_v25, %v4662_v26 }
 0x29e   : > { %v4665_v3 = vpop.f32.mrf.mxu0  ;;  %v2947_v7 = vpop.f32.mrf.mxu1 }
 0x29f   : > { %v2956_v19 = vadd.f32 %v4938_v60, %v4664_v43  ;;  %v2948_v11 = vadd.f32 %v4658_v5, %v2947_v7 }
 0x2a0   : > { %v4666_v27 = vpop.f32.mrf.mxu0  ;;  %v4939_v58 = vpop.f32.mrf.mxu1 }
 0x2a1   : > { %v6561_v22 = vadd.f32 %v2956_v19, %v6468_v51  ;;  %v6564_v52 = vadd.f32 %v2948_v11, %v6456_v59  ;;  %v4667_v35 = vadd.f32 %v4666_v27, %v4665_v3 }
 0x2a2   : > { %v2950_v29 = vpop.f32.mrf.mxu1  ;;  %v4958_v32 = vpop.f32.mrf.mxu0 }
 0x2a3   : > { %v2959_v13 = vadd.f32 %v4939_v58, %v4667_v35  ;;  %v2951_v33 = vadd.f32 %v4661_v6, %v2950_v29 }
 0x2a4   : > { %v4706_v0 = vpop.f32.mrf.mxu1  ;;  %v3642_v62 = vpop.f32.mrf.mxu0 }
 0x2a5   : > { %v6567_v55 = vadd.f32 %v2959_v13, %v6477_v40  ;;  %v6570_v34 = vadd.f32 %v2951_v33, %v6462_v14 }
 0x2a6   : > { %v4707_v4 = vpop.f32.mrf.mxu1  ;;  %v4959_v28 = vpop.f32.mrf.mxu0 }
 0x2a7   : > { %v4708_v51 = vadd.f32 %v4707_v4, %v4706_v0 }
 0x2a8   : > { %v4709_v45 = vpop.f32.mrf.mxu1  ;;  %v3645_v20 = vpop.f32.mrf.mxu0 }
 0x2a9   : > { %v3643_v5 = vadd.f32 %v4708_v51, %v3642_v62 }
 0x2aa   : > { %v4710_v23 = vpop.f32.mrf.mxu1  ;;  %v4962_v47 = vpop.f32.mrf.mxu0 }
 0x2ab   : > { %v4711_v39 = vadd.f32 %v4710_v23, %v4709_v45  ;;  %v3753_v30 = vadd.f32 %v3643_v5, %v6480_v31 }
 0x2ac   : > { %v4712_v59 = vpop.f32.mrf.mxu1  ;;  %v3658_v27 = vpop.f32.mrf.mxu0 }
 0x2ad   : > { %v3646_v40 = vadd.f32 %v4711_v39, %v3645_v20  ;;  %v3781_v25 = vmax.f32 %v3753_v30, 0.0 }
 0x2ae   : > { %v4713_v56 = vpop.f32.mrf.mxu1  ;;  %v4963_v33 = vpop.f32.mrf.mxu0 }
 0x2af   : > { %v4714_v63 = vadd.f32 %v4713_v56, %v4712_v59  ;;  %v3754_v60 = vadd.f32 %v3646_v40, %v6488_v37 }
 0x2b0   : > { %v4715_v8 = vpop.f32.mrf.mxu1  ;;  %v3661_v45 = vpop.f32.mrf.mxu0 }
 0x2b1   : > { %v3651_v6 = vadd.f32 %v4958_v32, %v4714_v63  ;;  %v3782_v31 = vmax.f32 %v3754_v60, 0.0 }
 0x2b2   : > { %v4716_v21 = vpop.f32.mrf.mxu1  ;;  %v4966_v56 = vpop.f32.mrf.mxu0 }
 0x2b3   : > { %v3755_v14 = vadd.f32 %v3651_v6, %v6473_v61  ;;  %v4717_v26 = vadd.f32 %v4716_v21, %v4715_v8 }
 0x2b4   : > { %v4718_v16 = vpop.f32.mrf.mxu1 }
 0x2b5   : > { %v3783_v43 = vmax.f32 %v3755_v14, 0.0  ;;  %v3654_v3 = vadd.f32 %v4959_v28, %v4717_v26  ;;  %v3674_v26 = vpop.f32.mrf.mxu0 }
 0x2b6   : > { %v4719_v7 = vpop.f32.mrf.mxu1 }
 0x2b7   : > { %v3841_v19 = vmax.f32 %v3781_v25, %v3783_v43  ;;  %v3756_v11 = vadd.f32 %v3654_v3, %v6484_v54  ;;  %v4720_v29 = vadd.f32 %v4719_v7, %v4718_v16  ;;  %v4967_v3 = vpop.f32.mrf.mxu0 }
 0x2b8   : > { %v4721_v58 = vpop.f32.mrf.mxu1 }
 0x2b9   : > { %3843 = vst [vmem:[#allocation4] sm:$0xff] %v3841_v19  ;;  %v3784_v35 = vmax.f32 %v3756_v11, 0.0  ;;  %v3659_v0 = vadd.f32 %v4720_v29, %v3658_v27  ;;  %v3677_v27 = vpop.f32.mrf.mxu0 }
 0x2ba   : > { %v4722_v13 = vpop.f32.mrf.mxu1 }
 0x2bb   : > { %v3842_v61 = vmax.f32 %v3782_v31, %v3784_v35  ;;  %v4723_v4 = vadd.f32 %v4722_v13, %v4721_v58  ;;  %v3757_v23 = vadd.f32 %v3659_v0, %v6496_v53 }
 0x2bc   : > { %v4724_v32 = vpop.f32.mrf.mxu1 }
 0x2bd   : > { %3844 = vst [vmem:[#allocation4 + $0x8] sm:$0xff] %v3842_v61  ;;  %v3662_v54 = vadd.f32 %v4723_v4, %v3661_v45  ;;  %v3785_v20 = vmax.f32 %v3757_v23, 0.0  ;;  %v4970_v4 = vpop.f32.mrf.mxu0 }
 0x2be   : > { %v4725_v37 = vpop.f32.mrf.mxu1 }
 0x2bf   : > { %v4726_v62 = vadd.f32 %v4725_v37, %v4724_v32  ;;  %v3758_v8 = vadd.f32 %v3662_v54, %v6504_v48 }
 0x2c0   : > { %v4727_v51 = vpop.f32.mrf.mxu1 }
 0x2c1   : > { %v3667_v28 = vadd.f32 %v4962_v47, %v4726_v62  ;;  %v3786_v16 = vmax.f32 %v3758_v8, 0.0 }
 0x2c2   : > { %v4728_v59 = vpop.f32.mrf.mxu1 }
 0x2c3   : > { %v3759_v5 = vadd.f32 %v3667_v28, %v6492_v12  ;;  %v4729_v39 = vadd.f32 %v4728_v59, %v4727_v51 }
 0x2c4   : > { %v4730_v63 = vpop.f32.mrf.mxu1  ;;  %v3893_v29 = vld [vmem:[#allocation4] ss:$2 sm:$0x7f]  ;;  %v3895_v61 = vld [vmem:[#allocation4 + $0x1] ss:$2 sm:$0x7f] }
 0x2c5   : > { %v3787_v30 = vmax.f32 %v3759_v5, 0.0  ;;  %v3670_v40 = vadd.f32 %v4963_v33, %v4729_v39  ;;  %v3896_v28 = vmax.f32 %v3893_v29, %v3895_v61 }
 0x2c6   : > { %v4731_v6 = vpop.f32.mrf.mxu1 }
 0x2c7   : > { %v3849_v21 = vmax.f32 %v3785_v20, %v3787_v30  ;;  %v3760_v14 = vadd.f32 %v3670_v40, %v6500_v46  ;;  %v4732_v53 = vadd.f32 %v4731_v6, %v4730_v63  ;;  %v3690_v63 = vpop.f32.mrf.mxu0 }
 0x2c8   : > { %v4733_v47 = vpop.f32.mrf.mxu1 }
 0x2c9   : > { %3851 = vst [vmem:[#allocation4 + $0x10] sm:$0xff] %v3849_v21  ;;  %v3788_v12 = vmax.f32 %v3760_v14, 0.0  ;;  %v3675_v43 = vadd.f32 %v4732_v53, %v3674_v26  ;;  %v4971_v14 = vpop.f32.mrf.mxu0 }
 0x2ca   : > { %v4734_v25 = vpop.f32.mrf.mxu1 }
 0x2cb   : > { %v3850_v60 = vmax.f32 %v3786_v16, %v3788_v12  ;;  %v4735_v48 = vadd.f32 %v4734_v25, %v4733_v47  ;;  %v3761_v11 = vadd.f32 %v3675_v43, %v6512_v2 }
 0x2cc   : > { %v4736_v7 = vpop.f32.mrf.mxu1 }
 0x2cd   : > { %3852 = vst [vmem:[#allocation4 + $0x18] sm:$0xff] %v3850_v60  ;;  %v3678_v31 = vadd.f32 %v4735_v48, %v3677_v27  ;;  %v3789_v33 = vmax.f32 %v3761_v11, 0.0 }
 0x2ce   : > { %v4737_v19 = vpop.f32.mrf.mxu1 }
 0x2cf   : > { %v4738_v46 = vadd.f32 %v4737_v19, %v4736_v7  ;;  %v3762_v2 = vadd.f32 %v3678_v31, %v6520_v36 }
 0x2d0   : > { %v4739_v58 = vpop.f32.mrf.mxu1 }
 0x2d1   : > { %v3683_v35 = vadd.f32 %v4966_v56, %v4738_v46  ;;  %v3790_v36 = vmax.f32 %v3762_v2, 0.0 }
 0x2d2   : > { %v4740_v13 = vpop.f32.mrf.mxu1 }
 0x2d3   : > { %v3763_v32 = vadd.f32 %v3683_v35, %v6508_v17  ;;  %v4741_v0 = vadd.f32 %v4740_v13, %v4739_v58 }
 0x2d4   : > { %v3898_v37 = vld [vmem:[#allocation4 + $0x10] ss:$2 sm:$0x7f]  ;;  %v3900_v62 = vld [vmem:[#allocation4 + $0x11] ss:$2 sm:$0x7f]  ;;  %v4742_v45 = vpop.f32.mrf.mxu1 }
 0x2d5   : > { %v3901_v51 = vmax.f32 %v3898_v37, %v3900_v62  ;;  %v3791_v23 = vmax.f32 %v3763_v32, 0.0  ;;  %v3686_v54 = vadd.f32 %v4967_v3, %v4741_v0 }
 0x2d6   : > { %v4743_v59 = vpop.f32.mrf.mxu1 }
 0x2d7   : > { %v3928_v17 = vrot.slane %v3901_v51, 1  ;;  %v3857_v5 = vmax.f32 %v3789_v33, %v3791_v23  ;;  %v3764_v39 = vadd.f32 %v3686_v54, %v6516_v42  ;;  %v4744_v56 = vadd.f32 %v4743_v59, %v4742_v45  ;;  %v3693_v42 = vpop.f32.mrf.mxu0 }
 0x2d8   : > { %v4745_v20 = vpop.f32.mrf.mxu1 }
 0x2d9   : > { %v3946_v8 = vsel %vm3945_vm9, %v3896_v28, %v3928_v17  ;;  %3859 = vst [vmem:[#allocation4 + $0x20] sm:$0xff] %v3857_v5  ;;  %v3792_v30 = vmax.f32 %v3764_v39, 0.0  ;;  %v3691_v21 = vadd.f32 %v4744_v56, %v3690_v63  ;;  %v4974_v11 = vpop.f32.mrf.mxu0 }
 0x2da   : > { %3957 = vst [vmem:[%s6588_s19] sm:$0xff] %v3946_v8  ;;  %v4746_v40 = vpop.f32.mrf.mxu1 }
 0x2db   : > { %v3858_v6 = vmax.f32 %v3790_v36, %v3792_v30  ;;  %v4747_v26 = vadd.f32 %v4746_v40, %v4745_v20  ;;  %v3765_v16 = vadd.f32 %v3691_v21, %v6527_v50 }
 0x2dc   : > { %v4748_v53 = vpop.f32.mrf.mxu1 }
 0x2dd   : > { %3860 = vst [vmem:[#allocation4 + $0x28] sm:$0xff] %v3858_v6  ;;  %v3694_v60 = vadd.f32 %v4747_v26, %v3693_v42  ;;  %v3793_v7 = vmax.f32 %v3765_v16, 0.0 }
 0x2de   : > { %v4749_v47 = vpop.f32.mrf.mxu1 }
 0x2df   : > { %v4750_v12 = vadd.f32 %v4749_v47, %v4748_v53  ;;  %v3766_v35 = vadd.f32 %v3694_v60, %v6534_v1 }
 0x2e0   : > { %v4751_v25 = vpop.f32.mrf.mxu1 }
 0x2e1   : > { %v3699_v43 = vadd.f32 %v4970_v4, %v4750_v12  ;;  %v3706_v4 = vpop.f32.mrf.mxu0  ;;  %v3794_v62 = vmax.f32 %v3766_v35, 0.0 }
 0x2e2   : > { %v4752_v3 = vpop.f32.mrf.mxu1 }
 0x2e3   : > { %v3767_v48 = vadd.f32 %v3699_v43, %v6523_v18  ;;  %v4753_v19 = vadd.f32 %v4752_v3, %v4751_v25  ;;  %v4975_v1 = vpop.f32.mrf.mxu0 }
 0x2e4   : > { %v3903_v46 = vld [vmem:[#allocation4 + $0x20] ss:$2 sm:$0x7f]  ;;  %v3905_v27 = vld [vmem:[#allocation4 + $0x21] ss:$2 sm:$0x7f]  ;;  %v4754_v58 = vpop.f32.mrf.mxu1 }
 0x2e5   : > { %v3906_v31 = vmax.f32 %v3903_v46, %v3905_v27  ;;  %v3795_v29 = vmax.f32 %v3767_v48, 0.0  ;;  %v3702_v50 = vadd.f32 %v4971_v14, %v4753_v19 }
 0x2e6   : > { %v4755_v13 = vpop.f32.mrf.mxu1 }
 0x2e7   : > { %v3931_v61 = vrot.slane %v3906_v31, 2  ;;  %v3865_v33 = vmax.f32 %v3793_v7, %v3795_v29  ;;  %v3768_v32 = vadd.f32 %v3702_v50, %v6530_v10  ;;  %v4756_v0 = vadd.f32 %v4755_v13, %v4754_v58  ;;  %v3709_v10 = vpop.f32.mrf.mxu0 }
 0x2e8   : > { %v4757_v18 = vpop.f32.mrf.mxu1 }
 0x2e9   : > { %v3948_v37 = vsel %vm3947_vm10, %v3928_v17, %v3931_v61  ;;  %3867 = vst [vmem:[#allocation4 + $0x30] sm:$0xff] %v3865_v33  ;;  %v3796_v45 = vmax.f32 %v3768_v32, 0.0  ;;  %v3707_v23 = vadd.f32 %v4756_v0, %v3706_v4  ;;  %v4978_v40 = vpop.f32.mrf.mxu0 }
 0x2ea   : > { %3958 = vst [vmem:[%s6588_s19 + $0x8] sm:$0xff] %v3948_v37  ;;  %v4758_v51 = vpop.f32.mrf.mxu1 }
 0x2eb   : > { %v3866_v2 = vmax.f32 %v3794_v62, %v3796_v45  ;;  %v4759_v28 = vadd.f32 %v4758_v51, %v4757_v18  ;;  %v3769_v5 = vadd.f32 %v3707_v23, %v6540_v9  ;;  %v3722_v43 = vpop.f32.mrf.mxu0 }
 0x2ec   : > { %v4760_v54 = vpop.f32.mrf.mxu1 }
 0x2ed   : > { %3868 = vst [vmem:[#allocation4 + $0x38] sm:$0xff] %v3866_v2  ;;  %v3710_v63 = vadd.f32 %v4759_v28, %v3709_v10  ;;  %v3797_v8 = vmax.f32 %v3769_v5, 0.0 }
 0x2ee   : > { %v4761_v59 = vpop.f32.mrf.mxu1 }
 0x2ef   : > { %v4762_v39 = vadd.f32 %v4761_v59, %v4760_v54  ;;  %v3770_v26 = vadd.f32 %v3710_v63, %v6546_v38  ;;  %v4979_v38 = vpop.f32.mrf.mxu0 }
 0x2f0   : > { %v4763_v56 = vpop.f32.mrf.mxu1 }
 0x2f1   : > { %v3715_v20 = vadd.f32 %v4974_v11, %v4762_v39  ;;  %v3798_v7 = vmax.f32 %v3770_v26, 0.0 }
 0x2f2   : > { %v4764_v17 = vpop.f32.mrf.mxu1 }
 0x2f3   : > { %v3771_v36 = vadd.f32 %v3715_v20, %v6537_v15  ;;  %v4765_v30 = vadd.f32 %v4764_v17, %v4763_v56 }
 0x2f4   : > { %v3908_v6 = vld [vmem:[#allocation4 + $0x30] ss:$2 sm:$0x7f]  ;;  %v3910_v21 = vld [vmem:[#allocation4 + $0x31] ss:$2 sm:$0x7f]  ;;  %v4766_v14 = vpop.f32.mrf.mxu1 }
 0x2f5   : > { %v3911_v53 = vmax.f32 %v3908_v6, %v3910_v21  ;;  %v3799_v47 = vmax.f32 %v3771_v36, 0.0  ;;  %v3718_v9 = vadd.f32 %v4975_v1, %v4765_v30 }
 0x2f6   : > { %v4767_v16 = vpop.f32.mrf.mxu1 }
 0x2f7   : > { %v3934_v12 = vrot.slane %v3911_v53, 3  ;;  %v3873_v42 = vmax.f32 %v3797_v8, %v3799_v47  ;;  %v3772_v25 = vadd.f32 %v3718_v9, %v6543_v24  ;;  %v4768_v60 = vadd.f32 %v4767_v16, %v4766_v14  ;;  %v3725_v24 = vpop.f32.mrf.mxu0 }
 0x2f8   : > { %v4769_v15 = vpop.f32.mrf.mxu1 }
 0x2f9   : > { %v3950_v3 = vsel %vm3949_vm11, %v3931_v61, %v3934_v12  ;;  %3875 = vst [vmem:[#allocation4 + $0x40] sm:$0xff] %v3873_v42  ;;  %v3800_v48 = vmax.f32 %v3772_v25, 0.0  ;;  %v3723_v46 = vadd.f32 %v4768_v60, %v3722_v43  ;;  %v4982_v18 = vpop.f32.mrf.mxu0 }
 0x2fa   : > { %3959 = vst [vmem:[%s6588_s19 + $0x10] sm:$0xff] %v3950_v3  ;;  %v4770_v19 = vpop.f32.mrf.mxu1 }
 0x2fb   : > { %v3874_v11 = vmax.f32 %v3798_v7, %v3800_v48  ;;  %v4771_v58 = vadd.f32 %v4770_v19, %v4769_v15  ;;  %v3773_v35 = vadd.f32 %v3723_v46, %v6552_v41  ;;  %v3738_v39 = vpop.f32.mrf.mxu0 }
 0x2fc   : > { %v4772_v27 = vpop.f32.mrf.mxu1 }
 0x2fd   : > { %3876 = vst [vmem:[#allocation4 + $0x48] sm:$0xff] %v3874_v11  ;;  %v3726_v13 = vadd.f32 %v4771_v58, %v3725_v24  ;;  %v3801_v32 = vmax.f32 %v3773_v35, 0.0 }
 0x2fe   : > { %v4773_v31 = vpop.f32.mrf.mxu1 }
 0x2ff   : > { %v4774_v29 = vadd.f32 %v4773_v31, %v4772_v27  ;;  %v3774_v2 = vadd.f32 %v3726_v13, %v6558_v49  ;;  %v4983_v49 = vpop.f32.mrf.mxu0 }
 0x300   : > { %v4775_v50 = vpop.f32.mrf.mxu1 }
 0x301   : > { %v3731_v33 = vadd.f32 %v4978_v40, %v4774_v29  ;;  %v3802_v56 = vmax.f32 %v3774_v2, 0.0  ;;  %v3741_v21 = vpop.f32.mrf.mxu0 }
 0x302   : > { %v4776_v61 = vpop.f32.mrf.mxu1 }
 0x303   : > { %v3775_v0 = vadd.f32 %v3731_v33, %v6549_v57  ;;  %v4777_v4 = vadd.f32 %v4776_v61, %v4775_v50 }
 0x304   : > { %v3913_v37 = vld [vmem:[#allocation4 + $0x40] ss:$2 sm:$0x7f]  ;;  %v3915_v62 = vld [vmem:[#allocation4 + $0x41] ss:$2 sm:$0x7f]  ;;  %v4778_v45 = vpop.f32.mrf.mxu1 }
 0x305   : > { %v3916_v51 = vmax.f32 %v3913_v37, %v3915_v62  ;;  %v3803_v23 = vmax.f32 %v3775_v0, 0.0  ;;  %v3734_v41 = vadd.f32 %v4979_v38, %v4777_v4 }
 0x306   : > { %v4779_v1 = vpop.f32.mrf.mxu1 }
 0x307   : > { %v3937_v54 = vrot.slane %v3916_v51, 4  ;;  %v3881_v28 = vmax.f32 %v3801_v32, %v3803_v23  ;;  %v3776_v59 = vadd.f32 %v3734_v41, %v6555_v44  ;;  %v4780_v5 = vadd.f32 %v4779_v1, %v4778_v45 }
 0x308   : > { %v4781_v10 = vpop.f32.mrf.mxu1 }
 0x309   : > { %v3952_v57 = vsel %vm1199_vm7, %v3934_v12, %v3937_v54  ;;  %3883 = vst [vmem:[#allocation4 + $0x50] sm:$0xff] %v3881_v28  ;;  %v3804_v63 = vmax.f32 %v3776_v59, 0.0  ;;  %v3739_v8 = vadd.f32 %v4780_v5, %v3738_v39 }
 0x30a   : > { %3960 = vst [vmem:[%s6588_s19 + $0x18] sm:$0xff] %v3952_v57  ;;  %v4782_v20 = vpop.f32.mrf.mxu1 }
 0x30b   : > { %v3882_v17 = vmax.f32 %v3802_v56, %v3804_v63  ;;  %v4783_v30 = vadd.f32 %v4782_v20, %v4781_v10  ;;  %v3777_v6 = vadd.f32 %v3739_v8, %v6564_v52 }
 0x30c   : > { %v4784_v36 = vpop.f32.mrf.mxu1 }
 0x30d   : > { %3884 = vst [vmem:[#allocation4 + $0x58] sm:$0xff] %v3882_v17  ;;  %v3742_v53 = vadd.f32 %v4783_v30, %v3741_v21  ;;  %v3805_v9 = vmax.f32 %v3777_v6, 0.0 }
 0x30e   : > { %v4785_v40 = vpop.f32.mrf.mxu1 }
 0x30f   : > { %v4786_v44 = vadd.f32 %v4785_v40, %v4784_v36  ;;  %v3778_v43 = vadd.f32 %v3742_v53, %v6570_v34 }
 0x310   : > { %v4787_v14 = vpop.f32.mrf.mxu1 }
 0x311   : > { %v3747_v26 = vadd.f32 %v4982_v18, %v4786_v44  ;;  %v3806_v11 = vmax.f32 %v3778_v43, 0.0 }
 0x312   : > { %v4788_v47 = vpop.f32.mrf.mxu1 }
 0x313   : > { %v3779_v16 = vadd.f32 %v3747_v26, %v6561_v22  ;;  %v4789_v12 = vadd.f32 %v4788_v47, %v4787_v14 }
 0x314   : > { %v3918_v42 = vld [vmem:[#allocation4 + $0x50] ss:$2 sm:$0x7f]  ;;  %v3920_v25 = vld [vmem:[#allocation4 + $0x51] ss:$2 sm:$0x7f] }
 0x315   : > { %v3921_v60 = vmax.f32 %v3918_v42, %v3920_v25  ;;  %v3807_v15 = vmax.f32 %v3779_v16, 0.0  ;;  %v3750_v3 = vadd.f32 %v4983_v49, %v4789_v12 }
 0x317   : > { %v3940_v7 = vrot.slane %v3921_v60, 5  ;;  %v3889_v52 = vmax.f32 %v3805_v9, %v3807_v15  ;;  %v3780_v48 = vadd.f32 %v3750_v3, %v6567_v55 }
 0x319   : > { %v3954_v19 = vsel %vm1268_vm1, %v3937_v54, %v3940_v7  ;;  %3891 = vst [vmem:[#allocation4 + $0x60] sm:$0xff] %v3889_v52  ;;  %v3808_v46 = vmax.f32 %v3780_v48, 0.0 }
 0x31a   : > { %3961 = vst [vmem:[%s6588_s19 + $0x20] sm:$0xff] %v3954_v19 }
 0x31b   : > { %v3890_v22 = vmax.f32 %v3806_v11, %v3808_v46 }
 0x31d   : > { %3892 = vst [vmem:[#allocation4 + $0x68] sm:$0xff] %v3890_v22 }
 0x324   : > { %v3923_v38 = vld [vmem:[#allocation4 + $0x60] ss:$2 sm:$0x7f]  ;;  %v3925_v27 = vld [vmem:[#allocation4 + $0x61] ss:$2 sm:$0x7f] }
 0x325   : > { %v3926_v58 = vmax.f32 %v3923_v38, %v3925_v27 }
 0x327   : > { %v3943_v34 = vrot.slane %v3926_v58, 6 }
 0x329   : > { %v3956_v31 = vsel %vm3955_vm12, %v3940_v7, %v3943_v34  ;;  %3963 = vst [vmem:[%s6588_s19 + $0x30] sm:$0x1] %v3943_v34 }
 0x32a   : > { %3962 = vst [vmem:[%s6588_s19 + $0x28] sm:$0xff] %v3956_v31 }
 0x32b PF: > { %s15_s18 = sadd.s32 1, %s5195_s18  }
 0x32c   : > { %p12_p5 = scmp.ge.s32.totalorder %s15_s18, 4  }
 0x32e   :  { %14 = sbr.rel (!%p12_p5) target bundleno = 1 (0x1), region = 85 }

</bundles_post_ra>
